<compile_context>
chip_gen: v6e
topology: v6e:2x2x1
jax: 0.10.0
libtpu: 0.0.40
codegen_flags: <defaults>
</compile_context>

<pallas_src>
import functools
from math import sqrt

import jax
import jax.numpy as jnp
from jax import lax
from jax.experimental import pallas as pl
from jax.experimental.pallas import tpu as pltpu

P = 16  # 4x4 spatial positions at the discriminator head


def _round_up(v, m):
    return (v + m - 1) // m * m


# ---------------------------------------------------------------------------
# Prologue: minibatch-std scalar.  Needs the whole batch, so it runs once,
# ungridded; the main kernel is then embarrassingly parallel over batch tiles.
# ---------------------------------------------------------------------------
def _mstd_kernel(x_ref, wrgb_ref, brgb_ref, o_ref, *, n_valid, n_pad, c):
    # from_rgb in f32 (tiny K=8 matmul; keep the statistic at full precision)
    x = x_ref[...].reshape(P * n_pad, 8)
    y = jnp.dot(x, wrgb_ref[...], preferred_element_type=jnp.float32) + brgb_ref[...]
    # population variance over the *valid* batch rows only (pad rows masked out)
    mask = (lax.broadcasted_iota(jnp.int32, (n_pad, 1), 0) < n_valid).astype(jnp.float32)
    inv_n = 1.0 / n_valid
    tot = jnp.zeros((1, 1), jnp.float32)
    for p in range(P):
        yp = y[p * n_pad:(p + 1) * n_pad, :] * mask
        mu = jnp.sum(yp, axis=0, keepdims=True) * inv_n
        d = (yp - mu) * mask
        var = jnp.sum(d * d, axis=0, keepdims=True) * inv_n            # (1, c)
        tot = tot + jnp.sum(jnp.sqrt(var + 1e-8), axis=-1, keepdims=True)
    o_ref[...] = tot * (1.0 / (P * c))


# ---------------------------------------------------------------------------
# Main fused forward, one batch tile per grid step.
# ---------------------------------------------------------------------------
def _disc_kernel(mstd_ref, x_ref, wrgb_ref, brgb_ref, w1p_ref, possum_ref, b1_ref,
                 w2_ref, b2_ref, wlin_ref, blin_ref, o_ref, pt_ref, hq_ref, *, tn, c):
    # ---- from_rgb 1x1 conv: one (P*tn, 8) @ (8, c) MXU matmul (K zero-padded 3->8) ----
    x = x_ref[...].reshape(P * tn, 8)
    y = jnp.dot(x, wrgb_ref[...], preferred_element_type=jnp.float32) + brgb_ref[...]

    # ---- conv1 (3x3, pad 1): all 9 taps fused along the lane dim into ONE bf16 matmul ----
    pt_ref[...] = jnp.dot(y.astype(jnp.bfloat16), w1p_ref[...],
                          preferred_element_type=jnp.float32)           # (P*tn, 9c) f32

    mstd = mstd_ref[...]             # (1, 1) minibatch-std scalar from the prologue
    bias1 = b1_ref[...]              # (1, c)
    # Gather the valid tap contributions per output position, fold the constant mstd
    # channel as a rank-1 correction, then fuse PixelNorm + LeakyReLU and write the
    # block straight into the conv2 operand (no full-slab intermediate).
    for po in range(P):
        io, jo = po // 4, po % 4
        acc = bias1 + mstd * possum_ref[po:po + 1, :]                   # (1, c)
        for dh in range(3):
            i_s = io + dh - 1
            if not 0 <= i_s < 4:
                continue
            for dw in range(3):
                j_s = jo + dw - 1
                if not 0 <= j_s < 4:
                    continue
                t = dh * 3 + dw
                psrc = i_s * 4 + j_s
                acc = acc + pt_ref[psrc * tn:(psrc + 1) * tn, t * c:(t + 1) * c]
        # PixelNorm (rsqrt -> EUP) + LeakyReLU(0.2), f32
        acc = acc * lax.rsqrt(jnp.mean(acc * acc, axis=-1, keepdims=True) + 1e-8)
        acc = jnp.where(acc >= 0, acc, 0.2 * acc)
        hq_ref[:, po * c:(po + 1) * c] = acc.astype(jnp.bfloat16)

    # ---- conv2 (4x4 VALID): single K=16c bf16 matmul + PixelNorm + LeakyReLU ----
    z = jnp.dot(hq_ref[...], w2_ref[...], preferred_element_type=jnp.float32) + b2_ref[...]
    z = z * lax.rsqrt(jnp.mean(z * z, axis=-1, keepdims=True) + 1e-8)
    z = jnp.where(z >= 0, z, 0.2 * z)

    # ---- EqualLinear head ----
    o_ref[...] = jnp.dot(z.astype(jnp.bfloat16), wlin_ref[...],
                         preferred_element_type=jnp.float32) + blin_ref[...]


def discriminator_forward(x_nchw, params):
    """Discriminator.forward(input, step=0, alpha=-1)."""
    n = x_nchw.shape[0]
    assert x_nchw.shape[1:] == (3, 4, 4)
    c = params["b1"].shape[1]

    # batch tile (multiple of 8 -> sublane-aligned slices); pad batch to a tile multiple
    tn = min(64, _round_up(n, 8))
    n_pad = _round_up(n, tn)

    # p-major slab x3d[p, b, k]: p = h*4+w, batch padded to n_pad, K padded 3 -> 8
    x3d = jnp.transpose(x_nchw, (2, 3, 0, 1)).reshape(P, n, 3)
    x3d = jnp.pad(x3d, ((0, 0), (0, n_pad - n), (0, 5)))

    # -- prologue: minibatch-std scalar over the (unpadded) batch --
    mstd = pl.pallas_call(
        functools.partial(_mstd_kernel, n_valid=n, n_pad=n_pad, c=c),
        out_shape=jax.ShapeDtypeStruct((1, 1), jnp.float32),
        in_specs=[pl.BlockSpec(memory_space=pltpu.MemorySpace.VMEM)] * 3,
        out_specs=pl.BlockSpec(memory_space=pltpu.MemorySpace.VMEM),
    )(x3d, params["w_rgb"], params["b_rgb"])

    # -- main kernel: gridded over batch tiles, weights resident via constant index_maps --
    grid = (n_pad // tn,)
    out = pl.pallas_call(
        functools.partial(_disc_kernel, tn=tn, c=c),
        out_shape=jax.ShapeDtypeStruct((n_pad, 1), jnp.float32),
        grid=grid,
        in_specs=[
            pl.BlockSpec((1, 1), lambda b: (0, 0)),              # mstd scalar
            pl.BlockSpec((P, tn, 8), lambda b: (0, b, 0)),       # x batch tile
            pl.BlockSpec((8, c), lambda b: (0, 0)),              # from_rgb weight (f32)
            pl.BlockSpec((1, c), lambda b: (0, 0)),              # from_rgb bias
            pl.BlockSpec((c, 9 * c), lambda b: (0, 0)),          # conv1 packed taps (bf16)
            pl.BlockSpec((P, c), lambda b: (0, 0)),              # mstd-channel tap sums
            pl.BlockSpec((1, c), lambda b: (0, 0)),              # conv1 bias
            pl.BlockSpec((P * c, c), lambda b: (0, 0)),          # conv2 packed (bf16)
            pl.BlockSpec((1, c), lambda b: (0, 0)),              # conv2 bias
            pl.BlockSpec((c, 1), lambda b: (0, 0)),              # linear weight (bf16)
            pl.BlockSpec((1, 1), lambda b: (0, 0)),              # linear bias
        ],
        out_specs=pl.BlockSpec((tn, 1), lambda b: (b, 0)),
        scratch_shapes=[pltpu.VMEM((P * tn, 9 * c), jnp.float32),   # fused conv1 tap products
                        pltpu.VMEM((tn, P * c), jnp.bfloat16)],     # conv2 (N, 16c) operand
        compiler_params=pltpu.CompilerParams(dimension_semantics=("parallel",)),
    )(mstd, x3d, params["w_rgb"], params["b_rgb"], params["w1_packed"], params["w1_possum"],
      params["b1"], params["w2"], params["b2"], params["w_lin"], params["b_lin"])
    return out[:n]


def init_params(key, feat_dim):
    """Deterministic init mirroring the PyTorch __init__ (normal weights, zero biases,
    EqualLR scale sqrt(2/fan_in)) for the modules used by the step=0 path."""
    c = feat_dim
    k0, k1, k2, k3 = jax.random.split(key, 4)
    w_rgb = jax.random.normal(k0, (c, 3, 1, 1), jnp.float32) * sqrt(2.0 / 3.0)             # from_rgb[6]
    w1 = jax.random.normal(k1, (c, c + 1, 3, 3), jnp.float32) * sqrt(2.0 / ((c + 1) * 9))  # conv1
    w2 = jax.random.normal(k2, (c, c, 4, 4), jnp.float32) * sqrt(2.0 / (c * 16))           # conv2
    w_lin = jax.random.normal(k3, (1, c), jnp.float32) * sqrt(2.0 / c)                     # EqualLinear

    w1_t = jnp.transpose(w1, (2, 3, 1, 0))                 # (dh, dw, ci, co)
    w1_y = w1_t[:, :, :c, :].reshape(9, c, c)              # (t, ci, co), t = dh*3+dw
    w1_e = w1_t[:, :, c, :].reshape(9, c)                  # taps over the mstd extra channel
    # validity of tap (dh,dw) at output position p=(i,j) under 1-pixel zero padding of a 4x4 map
    valid = jnp.array(
        [[1.0 if (0 <= (p // 4) + dh - 1 < 4 and 0 <= (p % 4) + dw - 1 < 4) else 0.0
          for dh in range(3) for dw in range(3)]
         for p in range(P)], jnp.float32)                  # (16, 9)
    possum = valid @ w1_e                                  # (16, c): per-position mstd tap-sum

    wrgb2d = w_rgb.reshape(c, 3).T                         # (3, c)
    wrgb_pad = jnp.zeros((8, c), jnp.float32).at[:3, :].set(wrgb2d)   # K padded 3 -> 8

    params = {
        "w_rgb": wrgb_pad,                                                        # (8, c) f32
        "b_rgb": jnp.zeros((1, c), jnp.float32),
        # packed conv1 taps: W1p[ci, t*c + co] = w1[co, ci, dh, dw], bf16 MXU operand
        "w1_packed": jnp.transpose(w1_y, (1, 0, 2)).reshape(c, 9 * c).astype(jnp.bfloat16),
        "w1_possum": possum,                                                      # (16, c) f32
        "b1": jnp.zeros((1, c), jnp.float32),
        # packed conv2: rows = (p, ci) matching the hq re-layout, bf16 MXU operand
        "w2": jnp.transpose(w2, (2, 3, 1, 0)).reshape(P * c, c).astype(jnp.bfloat16),
        "b2": jnp.zeros((1, c), jnp.float32),
        "w_lin": w_lin.T.astype(jnp.bfloat16),                                    # (c, 1)
        "b_lin": jnp.zeros((1, 1), jnp.float32),
    }
    raw = {"w_rgb": w_rgb, "w1": w1, "w2": w2, "w_lin": w_lin}
    return params, raw


def ref_forward(x, raw):
    """Pure-JAX (lax.conv, f32) reference of the same forward path."""
    dn = ("NCHW", "OIHW", "NCHW")
    out = lax.conv_general_dilated(x, raw["w_rgb"], (1, 1), "VALID", dimension_numbers=dn)
    out_std = jnp.sqrt(jnp.var(out, axis=0) + 1e-8)
    mean_std = jnp.broadcast_to(jnp.mean(out_std), (x.shape[0], 1, 4, 4))
    out = jnp.concatenate([out, mean_std], axis=1)
    out = lax.conv_general_dilated(out, raw["w1"], (1, 1), ((1, 1), (1, 1)), dimension_numbers=dn)
    out = out / jnp.sqrt(jnp.mean(out ** 2, axis=1, keepdims=True) + 1e-8)
    out = jnp.where(out >= 0, out, 0.2 * out)
    out = lax.conv_general_dilated(out, raw["w2"], (1, 1), "VALID", dimension_numbers=dn)
    out = out / jnp.sqrt(jnp.mean(out ** 2, axis=1, keepdims=True) + 1e-8)
    out = jnp.where(out >= 0, out, 0.2 * out)
    out = out[:, :, 0, 0]
    return out @ raw["w_lin"].T


if __name__ == "__main__":
    feat_dim = 32
    batch = 2
    key = jax.random.PRNGKey(0)
    k_x, k_p = jax.random.split(key)
    x = jax.random.normal(k_x, (batch, 3, 4, 4), jnp.float32)   # 4x4 RGB input (step=0)

    params, raw = init_params(k_p, feat_dim)

    out = jax.block_until_ready(discriminator_forward(x, params))
    assert out.shape == (batch, 1)

    ref = jax.block_until_ready(ref_forward(x, raw))
    # conv1/conv2/head use bf16 MXU operands (f32 accumulation), so compare against the
    # all-f32 reference with a correspondingly looser tolerance.
    assert jnp.allclose(out, ref, atol=5e-2, rtol=5e-2), (out, ref)

    print("KERNEL_OK")
</pallas_src>

<mosaic_0001>
module attributes {stable_mosaic.version = 11 : i64} {
  func.func @_mstd_kernel(%arg0: memref<16x8x8xf32, #tpu.memory_space<vmem>>, %arg1: memref<8x32xf32, #tpu.memory_space<vmem>>, %arg2: memref<1x32xf32, #tpu.memory_space<vmem>>, %arg3: memref<1x1xf32, #tpu.memory_space<vmem>>) attributes {dimension_semantics = [], scalar_prefetch = 0 : i64, scratch_operands = 0 : i64, tpu.core_type = #tpu.core_type<tc>} {
    %c0 = arith.constant 0 : index
    %c0_0 = arith.constant 0 : index
    %c0_1 = arith.constant 0 : index
    %0 = vector.load %arg0[%c0, %c0_0, %c0_1] : memref<16x8x8xf32, #tpu.memory_space<vmem>>, vector<16x8x8xf32>
    %1 = vector.shape_cast %0 : vector<16x8x8xf32> to vector<128x8xf32>
    %c0_2 = arith.constant 0 : index
    %c0_3 = arith.constant 0 : index
    %2 = vector.load %arg1[%c0_2, %c0_3] : memref<8x32xf32, #tpu.memory_space<vmem>>, vector<8x32xf32>
    %cst = arith.constant dense<0.000000e+00> : vector<128x32xf32>
    %3 = tpu.matmul %1, %2, %cst {dimension_numbers = #tpu.dot_dimension_numbers<[1], [0], [0], [1], [0, 0, 1, 1], [], []>} : vector<128x8xf32>, vector<8x32xf32>, vector<128x32xf32> -> vector<128x32xf32>
    %c0_4 = arith.constant 0 : index
    %c0_5 = arith.constant 0 : index
    %4 = vector.load %arg2[%c0_4, %c0_5] : memref<1x32xf32, #tpu.memory_space<vmem>>, vector<1x32xf32>
    %5 = vector.broadcast %4 : vector<1x32xf32> to vector<128x32xf32>
    %6 = arith.addf %3, %5 : vector<128x32xf32>
    %7 = tpu.iota {dimensions = array<i32: 0>} : vector<8x1xi32>
    %c2_i32 = arith.constant 2 : i32
    %8 = vector.broadcast %c2_i32 : i32 to vector<8x1xi32>
    %9 = arith.cmpi slt, %7, %8 : vector<8x1xi32>
    %10 = arith.extui %9 : vector<8x1xi1> to vector<8x1xi32>
    %11 = arith.sitofp %10 : vector<8x1xi32> to vector<8x1xf32>
    %cst_6 = arith.constant 0.000000e+00 : f32
    %12 = vector.broadcast %cst_6 : f32 to vector<1x1xf32>
    %13 = vector.extract_strided_slice %6 {offsets = [0, 0], sizes = [8, 32], strides = [1, 1]} : vector<128x32xf32> to vector<8x32xf32>
    %14 = vector.broadcast %11 : vector<8x1xf32> to vector<8x32xf32>
    %15 = arith.mulf %13, %14 : vector<8x32xf32>
    %cst_7 = arith.constant dense<0.000000e+00> : vector<32xf32>
    %16 = vector.multi_reduction <add>, %15, %cst_7 [0] : vector<8x32xf32> to vector<32xf32>
    %17 = vector.shape_cast %16 : vector<32xf32> to vector<1x32xf32>
    %cst_8 = arith.constant 5.000000e-01 : f32
    %18 = vector.broadcast %cst_8 : f32 to vector<1x32xf32>
    %19 = arith.mulf %17, %18 : vector<1x32xf32>
    %20 = vector.broadcast %19 : vector<1x32xf32> to vector<8x32xf32>
    %21 = arith.subf %15, %20 : vector<8x32xf32>
    %22 = vector.broadcast %11 : vector<8x1xf32> to vector<8x32xf32>
    %23 = arith.mulf %21, %22 : vector<8x32xf32>
    %24 = arith.mulf %23, %23 : vector<8x32xf32>
    %cst_9 = arith.constant dense<0.000000e+00> : vector<32xf32>
    %25 = vector.multi_reduction <add>, %24, %cst_9 [0] : vector<8x32xf32> to vector<32xf32>
    %26 = vector.shape_cast %25 : vector<32xf32> to vector<1x32xf32>
    %cst_10 = arith.constant 5.000000e-01 : f32
    %27 = vector.broadcast %cst_10 : f32 to vector<1x32xf32>
    %28 = arith.mulf %26, %27 : vector<1x32xf32>
    %cst_11 = arith.constant 9.99999993E-9 : f32
    %29 = vector.broadcast %cst_11 : f32 to vector<1x32xf32>
    %30 = arith.addf %28, %29 : vector<1x32xf32>
    %31 = math.sqrt %30 : vector<1x32xf32>
    %cst_12 = arith.constant dense<0.000000e+00> : vector<1xf32>
    %32 = vector.multi_reduction <add>, %31, %cst_12 [1] : vector<1x32xf32> to vector<1xf32>
    %33 = vector.shape_cast %32 : vector<1xf32> to vector<1x1xf32>
    %34 = arith.addf %12, %33 : vector<1x1xf32>
    %35 = vector.extract_strided_slice %6 {offsets = [8, 0], sizes = [8, 32], strides = [1, 1]} : vector<128x32xf32> to vector<8x32xf32>
    %36 = vector.broadcast %11 : vector<8x1xf32> to vector<8x32xf32>
    %37 = arith.mulf %35, %36 : vector<8x32xf32>
    %cst_13 = arith.constant dense<0.000000e+00> : vector<32xf32>
    %38 = vector.multi_reduction <add>, %37, %cst_13 [0] : vector<8x32xf32> to vector<32xf32>
    %39 = vector.shape_cast %38 : vector<32xf32> to vector<1x32xf32>
    %cst_14 = arith.constant 5.000000e-01 : f32
    %40 = vector.broadcast %cst_14 : f32 to vector<1x32xf32>
    %41 = arith.mulf %39, %40 : vector<1x32xf32>
    %42 = vector.broadcast %41 : vector<1x32xf32> to vector<8x32xf32>
    %43 = arith.subf %37, %42 : vector<8x32xf32>
    %44 = vector.broadcast %11 : vector<8x1xf32> to vector<8x32xf32>
    %45 = arith.mulf %43, %44 : vector<8x32xf32>
    %46 = arith.mulf %45, %45 : vector<8x32xf32>
    %cst_15 = arith.constant dense<0.000000e+00> : vector<32xf32>
    %47 = vector.multi_reduction <add>, %46, %cst_15 [0] : vector<8x32xf32> to vector<32xf32>
    %48 = vector.shape_cast %47 : vector<32xf32> to vector<1x32xf32>
    %cst_16 = arith.constant 5.000000e-01 : f32
    %49 = vector.broadcast %cst_16 : f32 to vector<1x32xf32>
    %50 = arith.mulf %48, %49 : vector<1x32xf32>
    %cst_17 = arith.constant 9.99999993E-9 : f32
    %51 = vector.broadcast %cst_17 : f32 to vector<1x32xf32>
    %52 = arith.addf %50, %51 : vector<1x32xf32>
    %53 = math.sqrt %52 : vector<1x32xf32>
    %cst_18 = arith.constant dense<0.000000e+00> : vector<1xf32>
    %54 = vector.multi_reduction <add>, %53, %cst_18 [1] : vector<1x32xf32> to vector<1xf32>
    %55 = vector.shape_cast %54 : vector<1xf32> to vector<1x1xf32>
    %56 = arith.addf %34, %55 : vector<1x1xf32>
    %57 = vector.extract_strided_slice %6 {offsets = [16, 0], sizes = [8, 32], strides = [1, 1]} : vector<128x32xf32> to vector<8x32xf32>
    %58 = vector.broadcast %11 : vector<8x1xf32> to vector<8x32xf32>
    %59 = arith.mulf %57, %58 : vector<8x32xf32>
    %cst_19 = arith.constant dense<0.000000e+00> : vector<32xf32>
    %60 = vector.multi_reduction <add>, %59, %cst_19 [0] : vector<8x32xf32> to vector<32xf32>
    %61 = vector.shape_cast %60 : vector<32xf32> to vector<1x32xf32>
    %cst_20 = arith.constant 5.000000e-01 : f32
    %62 = vector.broadcast %cst_20 : f32 to vector<1x32xf32>
    %63 = arith.mulf %61, %62 : vector<1x32xf32>
    %64 = vector.broadcast %63 : vector<1x32xf32> to vector<8x32xf32>
    %65 = arith.subf %59, %64 : vector<8x32xf32>
    %66 = vector.broadcast %11 : vector<8x1xf32> to vector<8x32xf32>
    %67 = arith.mulf %65, %66 : vector<8x32xf32>
    %68 = arith.mulf %67, %67 : vector<8x32xf32>
    %cst_21 = arith.constant dense<0.000000e+00> : vector<32xf32>
    %69 = vector.multi_reduction <add>, %68, %cst_21 [0] : vector<8x32xf32> to vector<32xf32>
    %70 = vector.shape_cast %69 : vector<32xf32> to vector<1x32xf32>
    %cst_22 = arith.constant 5.000000e-01 : f32
    %71 = vector.broadcast %cst_22 : f32 to vector<1x32xf32>
    %72 = arith.mulf %70, %71 : vector<1x32xf32>
    %cst_23 = arith.constant 9.99999993E-9 : f32
    %73 = vector.broadcast %cst_23 : f32 to vector<1x32xf32>
    %74 = arith.addf %72, %73 : vector<1x32xf32>
    %75 = math.sqrt %74 : vector<1x32xf32>
    %cst_24 = arith.constant dense<0.000000e+00> : vector<1xf32>
    %76 = vector.multi_reduction <add>, %75, %cst_24 [1] : vector<1x32xf32> to vector<1xf32>
    %77 = vector.shape_cast %76 : vector<1xf32> to vector<1x1xf32>
    %78 = arith.addf %56, %77 : vector<1x1xf32>
    %79 = vector.extract_strided_slice %6 {offsets = [24, 0], sizes = [8, 32], strides = [1, 1]} : vector<128x32xf32> to vector<8x32xf32>
    %80 = vector.broadcast %11 : vector<8x1xf32> to vector<8x32xf32>
    %81 = arith.mulf %79, %80 : vector<8x32xf32>
    %cst_25 = arith.constant dense<0.000000e+00> : vector<32xf32>
    %82 = vector.multi_reduction <add>, %81, %cst_25 [0] : vector<8x32xf32> to vector<32xf32>
    %83 = vector.shape_cast %82 : vector<32xf32> to vector<1x32xf32>
    %cst_26 = arith.constant 5.000000e-01 : f32
    %84 = vector.broadcast %cst_26 : f32 to vector<1x32xf32>
    %85 = arith.mulf %83, %84 : vector<1x32xf32>
    %86 = vector.broadcast %85 : vector<1x32xf32> to vector<8x32xf32>
    %87 = arith.subf %81, %86 : vector<8x32xf32>
    %88 = vector.broadcast %11 : vector<8x1xf32> to vector<8x32xf32>
    %89 = arith.mulf %87, %88 : vector<8x32xf32>
    %90 = arith.mulf %89, %89 : vector<8x32xf32>
    %cst_27 = arith.constant dense<0.000000e+00> : vector<32xf32>
    %91 = vector.multi_reduction <add>, %90, %cst_27 [0] : vector<8x32xf32> to vector<32xf32>
    %92 = vector.shape_cast %91 : vector<32xf32> to vector<1x32xf32>
    %cst_28 = arith.constant 5.000000e-01 : f32
    %93 = vector.broadcast %cst_28 : f32 to vector<1x32xf32>
    %94 = arith.mulf %92, %93 : vector<1x32xf32>
    %cst_29 = arith.constant 9.99999993E-9 : f32
    %95 = vector.broadcast %cst_29 : f32 to vector<1x32xf32>
    %96 = arith.addf %94, %95 : vector<1x32xf32>
    %97 = math.sqrt %96 : vector<1x32xf32>
    %cst_30 = arith.constant dense<0.000000e+00> : vector<1xf32>
    %98 = vector.multi_reduction <add>, %97, %cst_30 [1] : vector<1x32xf32> to vector<1xf32>
    %99 = vector.shape_cast %98 : vector<1xf32> to vector<1x1xf32>
    %100 = arith.addf %78, %99 : vector<1x1xf32>
    %101 = vector.extract_strided_slice %6 {offsets = [32, 0], sizes = [8, 32], strides = [1, 1]} : vector<128x32xf32> to vector<8x32xf32>
    %102 = vector.broadcast %11 : vector<8x1xf32> to vector<8x32xf32>
    %103 = arith.mulf %101, %102 : vector<8x32xf32>
    %cst_31 = arith.constant dense<0.000000e+00> : vector<32xf32>
    %104 = vector.multi_reduction <add>, %103, %cst_31 [0] : vector<8x32xf32> to vector<32xf32>
    %105 = vector.shape_cast %104 : vector<32xf32> to vector<1x32xf32>
    %cst_32 = arith.constant 5.000000e-01 : f32
    %106 = vector.broadcast %cst_32 : f32 to vector<1x32xf32>
    %107 = arith.mulf %105, %106 : vector<1x32xf32>
    %108 = vector.broadcast %107 : vector<1x32xf32> to vector<8x32xf32>
    %109 = arith.subf %103, %108 : vector<8x32xf32>
    %110 = vector.broadcast %11 : vector<8x1xf32> to vector<8x32xf32>
    %111 = arith.mulf %109, %110 : vector<8x32xf32>
    %112 = arith.mulf %111, %111 : vector<8x32xf32>
    %cst_33 = arith.constant dense<0.000000e+00> : vector<32xf32>
    %113 = vector.multi_reduction <add>, %112, %cst_33 [0] : vector<8x32xf32> to vector<32xf32>
    %114 = vector.shape_cast %113 : vector<32xf32> to vector<1x32xf32>
    %cst_34 = arith.constant 5.000000e-01 : f32
    %115 = vector.broadcast %cst_34 : f32 to vector<1x32xf32>
    %116 = arith.mulf %114, %115 : vector<1x32xf32>
    %cst_35 = arith.constant 9.99999993E-9 : f32
    %117 = vector.broadcast %cst_35 : f32 to vector<1x32xf32>
    %118 = arith.addf %116, %117 : vector<1x32xf32>
    %119 = math.sqrt %118 : vector<1x32xf32>
    %cst_36 = arith.constant dense<0.000000e+00> : vector<1xf32>
    %120 = vector.multi_reduction <add>, %119, %cst_36 [1] : vector<1x32xf32> to vector<1xf32>
    %121 = vector.shape_cast %120 : vector<1xf32> to vector<1x1xf32>
    %122 = arith.addf %100, %121 : vector<1x1xf32>
    %123 = vector.extract_strided_slice %6 {offsets = [40, 0], sizes = [8, 32], strides = [1, 1]} : vector<128x32xf32> to vector<8x32xf32>
    %124 = vector.broadcast %11 : vector<8x1xf32> to vector<8x32xf32>
    %125 = arith.mulf %123, %124 : vector<8x32xf32>
    %cst_37 = arith.constant dense<0.000000e+00> : vector<32xf32>
    %126 = vector.multi_reduction <add>, %125, %cst_37 [0] : vector<8x32xf32> to vector<32xf32>
    %127 = vector.shape_cast %126 : vector<32xf32> to vector<1x32xf32>
    %cst_38 = arith.constant 5.000000e-01 : f32
    %128 = vector.broadcast %cst_38 : f32 to vector<1x32xf32>
    %129 = arith.mulf %127, %128 : vector<1x32xf32>
    %130 = vector.broadcast %129 : vector<1x32xf32> to vector<8x32xf32>
    %131 = arith.subf %125, %130 : vector<8x32xf32>
    %132 = vector.broadcast %11 : vector<8x1xf32> to vector<8x32xf32>
    %133 = arith.mulf %131, %132 : vector<8x32xf32>
    %134 = arith.mulf %133, %133 : vector<8x32xf32>
    %cst_39 = arith.constant dense<0.000000e+00> : vector<32xf32>
    %135 = vector.multi_reduction <add>, %134, %cst_39 [0] : vector<8x32xf32> to vector<32xf32>
    %136 = vector.shape_cast %135 : vector<32xf32> to vector<1x32xf32>
    %cst_40 = arith.constant 5.000000e-01 : f32
    %137 = vector.broadcast %cst_40 : f32 to vector<1x32xf32>
    %138 = arith.mulf %136, %137 : vector<1x32xf32>
    %cst_41 = arith.constant 9.99999993E-9 : f32
    %139 = vector.broadcast %cst_41 : f32 to vector<1x32xf32>
    %140 = arith.addf %138, %139 : vector<1x32xf32>
    %141 = math.sqrt %140 : vector<1x32xf32>
    %cst_42 = arith.constant dense<0.000000e+00> : vector<1xf32>
    %142 = vector.multi_reduction <add>, %141, %cst_42 [1] : vector<1x32xf32> to vector<1xf32>
    %143 = vector.shape_cast %142 : vector<1xf32> to vector<1x1xf32>
    %144 = arith.addf %122, %143 : vector<1x1xf32>
    %145 = vector.extract_strided_slice %6 {offsets = [48, 0], sizes = [8, 32], strides = [1, 1]} : vector<128x32xf32> to vector<8x32xf32>
    %146 = vector.broadcast %11 : vector<8x1xf32> to vector<8x32xf32>
    %147 = arith.mulf %145, %146 : vector<8x32xf32>
    %cst_43 = arith.constant dense<0.000000e+00> : vector<32xf32>
    %148 = vector.multi_reduction <add>, %147, %cst_43 [0] : vector<8x32xf32> to vector<32xf32>
    %149 = vector.shape_cast %148 : vector<32xf32> to vector<1x32xf32>
    %cst_44 = arith.constant 5.000000e-01 : f32
    %150 = vector.broadcast %cst_44 : f32 to vector<1x32xf32>
    %151 = arith.mulf %149, %150 : vector<1x32xf32>
    %152 = vector.broadcast %151 : vector<1x32xf32> to vector<8x32xf32>
    %153 = arith.subf %147, %152 : vector<8x32xf32>
    %154 = vector.broadcast %11 : vector<8x1xf32> to vector<8x32xf32>
    %155 = arith.mulf %153, %154 : vector<8x32xf32>
    %156 = arith.mulf %155, %155 : vector<8x32xf32>
    %cst_45 = arith.constant dense<0.000000e+00> : vector<32xf32>
    %157 = vector.multi_reduction <add>, %156, %cst_45 [0] : vector<8x32xf32> to vector<32xf32>
    %158 = vector.shape_cast %157 : vector<32xf32> to vector<1x32xf32>
    %cst_46 = arith.constant 5.000000e-01 : f32
    %159 = vector.broadcast %cst_46 : f32 to vector<1x32xf32>
    %160 = arith.mulf %158, %159 : vector<1x32xf32>
    %cst_47 = arith.constant 9.99999993E-9 : f32
    %161 = vector.broadcast %cst_47 : f32 to vector<1x32xf32>
    %162 = arith.addf %160, %161 : vector<1x32xf32>
    %163 = math.sqrt %162 : vector<1x32xf32>
    %cst_48 = arith.constant dense<0.000000e+00> : vector<1xf32>
    %164 = vector.multi_reduction <add>, %163, %cst_48 [1] : vector<1x32xf32> to vector<1xf32>
    %165 = vector.shape_cast %164 : vector<1xf32> to vector<1x1xf32>
    %166 = arith.addf %144, %165 : vector<1x1xf32>
    %167 = vector.extract_strided_slice %6 {offsets = [56, 0], sizes = [8, 32], strides = [1, 1]} : vector<128x32xf32> to vector<8x32xf32>
    %168 = vector.broadcast %11 : vector<8x1xf32> to vector<8x32xf32>
    %169 = arith.mulf %167, %168 : vector<8x32xf32>
    %cst_49 = arith.constant dense<0.000000e+00> : vector<32xf32>
    %170 = vector.multi_reduction <add>, %169, %cst_49 [0] : vector<8x32xf32> to vector<32xf32>
    %171 = vector.shape_cast %170 : vector<32xf32> to vector<1x32xf32>
    %cst_50 = arith.constant 5.000000e-01 : f32
    %172 = vector.broadcast %cst_50 : f32 to vector<1x32xf32>
    %173 = arith.mulf %171, %172 : vector<1x32xf32>
    %174 = vector.broadcast %173 : vector<1x32xf32> to vector<8x32xf32>
    %175 = arith.subf %169, %174 : vector<8x32xf32>
    %176 = vector.broadcast %11 : vector<8x1xf32> to vector<8x32xf32>
    %177 = arith.mulf %175, %176 : vector<8x32xf32>
    %178 = arith.mulf %177, %177 : vector<8x32xf32>
    %cst_51 = arith.constant dense<0.000000e+00> : vector<32xf32>
    %179 = vector.multi_reduction <add>, %178, %cst_51 [0] : vector<8x32xf32> to vector<32xf32>
    %180 = vector.shape_cast %179 : vector<32xf32> to vector<1x32xf32>
    %cst_52 = arith.constant 5.000000e-01 : f32
    %181 = vector.broadcast %cst_52 : f32 to vector<1x32xf32>
    %182 = arith.mulf %180, %181 : vector<1x32xf32>
    %cst_53 = arith.constant 9.99999993E-9 : f32
    %183 = vector.broadcast %cst_53 : f32 to vector<1x32xf32>
    %184 = arith.addf %182, %183 : vector<1x32xf32>
    %185 = math.sqrt %184 : vector<1x32xf32>
    %cst_54 = arith.constant dense<0.000000e+00> : vector<1xf32>
    %186 = vector.multi_reduction <add>, %185, %cst_54 [1] : vector<1x32xf32> to vector<1xf32>
    %187 = vector.shape_cast %186 : vector<1xf32> to vector<1x1xf32>
    %188 = arith.addf %166, %187 : vector<1x1xf32>
    %189 = vector.extract_strided_slice %6 {offsets = [64, 0], sizes = [8, 32], strides = [1, 1]} : vector<128x32xf32> to vector<8x32xf32>
    %190 = vector.broadcast %11 : vector<8x1xf32> to vector<8x32xf32>
    %191 = arith.mulf %189, %190 : vector<8x32xf32>
    %cst_55 = arith.constant dense<0.000000e+00> : vector<32xf32>
    %192 = vector.multi_reduction <add>, %191, %cst_55 [0] : vector<8x32xf32> to vector<32xf32>
    %193 = vector.shape_cast %192 : vector<32xf32> to vector<1x32xf32>
    %cst_56 = arith.constant 5.000000e-01 : f32
    %194 = vector.broadcast %cst_56 : f32 to vector<1x32xf32>
    %195 = arith.mulf %193, %194 : vector<1x32xf32>
    %196 = vector.broadcast %195 : vector<1x32xf32> to vector<8x32xf32>
    %197 = arith.subf %191, %196 : vector<8x32xf32>
    %198 = vector.broadcast %11 : vector<8x1xf32> to vector<8x32xf32>
    %199 = arith.mulf %197, %198 : vector<8x32xf32>
    %200 = arith.mulf %199, %199 : vector<8x32xf32>
    %cst_57 = arith.constant dense<0.000000e+00> : vector<32xf32>
    %201 = vector.multi_reduction <add>, %200, %cst_57 [0] : vector<8x32xf32> to vector<32xf32>
    %202 = vector.shape_cast %201 : vector<32xf32> to vector<1x32xf32>
    %cst_58 = arith.constant 5.000000e-01 : f32
    %203 = vector.broadcast %cst_58 : f32 to vector<1x32xf32>
    %204 = arith.mulf %202, %203 : vector<1x32xf32>
    %cst_59 = arith.constant 9.99999993E-9 : f32
    %205 = vector.broadcast %cst_59 : f32 to vector<1x32xf32>
    %206 = arith.addf %204, %205 : vector<1x32xf32>
    %207 = math.sqrt %206 : vector<1x32xf32>
    %cst_60 = arith.constant dense<0.000000e+00> : vector<1xf32>
    %208 = vector.multi_reduction <add>, %207, %cst_60 [1] : vector<1x32xf32> to vector<1xf32>
    %209 = vector.shape_cast %208 : vector<1xf32> to vector<1x1xf32>
    %210 = arith.addf %188, %209 : vector<1x1xf32>
    %211 = vector.extract_strided_slice %6 {offsets = [72, 0], sizes = [8, 32], strides = [1, 1]} : vector<128x32xf32> to vector<8x32xf32>
    %212 = vector.broadcast %11 : vector<8x1xf32> to vector<8x32xf32>
    %213 = arith.mulf %211, %212 : vector<8x32xf32>
    %cst_61 = arith.constant dense<0.000000e+00> : vector<32xf32>
    %214 = vector.multi_reduction <add>, %213, %cst_61 [0] : vector<8x32xf32> to vector<32xf32>
    %215 = vector.shape_cast %214 : vector<32xf32> to vector<1x32xf32>
    %cst_62 = arith.constant 5.000000e-01 : f32
    %216 = vector.broadcast %cst_62 : f32 to vector<1x32xf32>
    %217 = arith.mulf %215, %216 : vector<1x32xf32>
    %218 = vector.broadcast %217 : vector<1x32xf32> to vector<8x32xf32>
    %219 = arith.subf %213, %218 : vector<8x32xf32>
    %220 = vector.broadcast %11 : vector<8x1xf32> to vector<8x32xf32>
    %221 = arith.mulf %219, %220 : vector<8x32xf32>
    %222 = arith.mulf %221, %221 : vector<8x32xf32>
    %cst_63 = arith.constant dense<0.000000e+00> : vector<32xf32>
    %223 = vector.multi_reduction <add>, %222, %cst_63 [0] : vector<8x32xf32> to vector<32xf32>
    %224 = vector.shape_cast %223 : vector<32xf32> to vector<1x32xf32>
    %cst_64 = arith.constant 5.000000e-01 : f32
    %225 = vector.broadcast %cst_64 : f32 to vector<1x32xf32>
    %226 = arith.mulf %224, %225 : vector<1x32xf32>
    %cst_65 = arith.constant 9.99999993E-9 : f32
    %227 = vector.broadcast %cst_65 : f32 to vector<1x32xf32>
    %228 = arith.addf %226, %227 : vector<1x32xf32>
    %229 = math.sqrt %228 : vector<1x32xf32>
    %cst_66 = arith.constant dense<0.000000e+00> : vector<1xf32>
    %230 = vector.multi_reduction <add>, %229, %cst_66 [1] : vector<1x32xf32> to vector<1xf32>
    %231 = vector.shape_cast %230 : vector<1xf32> to vector<1x1xf32>
    %232 = arith.addf %210, %231 : vector<1x1xf32>
    %233 = vector.extract_strided_slice %6 {offsets = [80, 0], sizes = [8, 32], strides = [1, 1]} : vector<128x32xf32> to vector<8x32xf32>
    %234 = vector.broadcast %11 : vector<8x1xf32> to vector<8x32xf32>
    %235 = arith.mulf %233, %234 : vector<8x32xf32>
    %cst_67 = arith.constant dense<0.000000e+00> : vector<32xf32>
    %236 = vector.multi_reduction <add>, %235, %cst_67 [0] : vector<8x32xf32> to vector<32xf32>
    %237 = vector.shape_cast %236 : vector<32xf32> to vector<1x32xf32>
    %cst_68 = arith.constant 5.000000e-01 : f32
    %238 = vector.broadcast %cst_68 : f32 to vector<1x32xf32>
    %239 = arith.mulf %237, %238 : vector<1x32xf32>
    %240 = vector.broadcast %239 : vector<1x32xf32> to vector<8x32xf32>
    %241 = arith.subf %235, %240 : vector<8x32xf32>
    %242 = vector.broadcast %11 : vector<8x1xf32> to vector<8x32xf32>
    %243 = arith.mulf %241, %242 : vector<8x32xf32>
    %244 = arith.mulf %243, %243 : vector<8x32xf32>
    %cst_69 = arith.constant dense<0.000000e+00> : vector<32xf32>
    %245 = vector.multi_reduction <add>, %244, %cst_69 [0] : vector<8x32xf32> to vector<32xf32>
    %246 = vector.shape_cast %245 : vector<32xf32> to vector<1x32xf32>
    %cst_70 = arith.constant 5.000000e-01 : f32
    %247 = vector.broadcast %cst_70 : f32 to vector<1x32xf32>
    %248 = arith.mulf %246, %247 : vector<1x32xf32>
    %cst_71 = arith.constant 9.99999993E-9 : f32
    %249 = vector.broadcast %cst_71 : f32 to vector<1x32xf32>
    %250 = arith.addf %248, %249 : vector<1x32xf32>
    %251 = math.sqrt %250 : vector<1x32xf32>
    %cst_72 = arith.constant dense<0.000000e+00> : vector<1xf32>
    %252 = vector.multi_reduction <add>, %251, %cst_72 [1] : vector<1x32xf32> to vector<1xf32>
    %253 = vector.shape_cast %252 : vector<1xf32> to vector<1x1xf32>
    %254 = arith.addf %232, %253 : vector<1x1xf32>
    %255 = vector.extract_strided_slice %6 {offsets = [88, 0], sizes = [8, 32], strides = [1, 1]} : vector<128x32xf32> to vector<8x32xf32>
    %256 = vector.broadcast %11 : vector<8x1xf32> to vector<8x32xf32>
    %257 = arith.mulf %255, %256 : vector<8x32xf32>
    %cst_73 = arith.constant dense<0.000000e+00> : vector<32xf32>
    %258 = vector.multi_reduction <add>, %257, %cst_73 [0] : vector<8x32xf32> to vector<32xf32>
    %259 = vector.shape_cast %258 : vector<32xf32> to vector<1x32xf32>
    %cst_74 = arith.constant 5.000000e-01 : f32
    %260 = vector.broadcast %cst_74 : f32 to vector<1x32xf32>
    %261 = arith.mulf %259, %260 : vector<1x32xf32>
    %262 = vector.broadcast %261 : vector<1x32xf32> to vector<8x32xf32>
    %263 = arith.subf %257, %262 : vector<8x32xf32>
    %264 = vector.broadcast %11 : vector<8x1xf32> to vector<8x32xf32>
    %265 = arith.mulf %263, %264 : vector<8x32xf32>
    %266 = arith.mulf %265, %265 : vector<8x32xf32>
    %cst_75 = arith.constant dense<0.000000e+00> : vector<32xf32>
    %267 = vector.multi_reduction <add>, %266, %cst_75 [0] : vector<8x32xf32> to vector<32xf32>
    %268 = vector.shape_cast %267 : vector<32xf32> to vector<1x32xf32>
    %cst_76 = arith.constant 5.000000e-01 : f32
    %269 = vector.broadcast %cst_76 : f32 to vector<1x32xf32>
    %270 = arith.mulf %268, %269 : vector<1x32xf32>
    %cst_77 = arith.constant 9.99999993E-9 : f32
    %271 = vector.broadcast %cst_77 : f32 to vector<1x32xf32>
    %272 = arith.addf %270, %271 : vector<1x32xf32>
    %273 = math.sqrt %272 : vector<1x32xf32>
    %cst_78 = arith.constant dense<0.000000e+00> : vector<1xf32>
    %274 = vector.multi_reduction <add>, %273, %cst_78 [1] : vector<1x32xf32> to vector<1xf32>
    %275 = vector.shape_cast %274 : vector<1xf32> to vector<1x1xf32>
    %276 = arith.addf %254, %275 : vector<1x1xf32>
    %277 = vector.extract_strided_slice %6 {offsets = [96, 0], sizes = [8, 32], strides = [1, 1]} : vector<128x32xf32> to vector<8x32xf32>
    %278 = vector.broadcast %11 : vector<8x1xf32> to vector<8x32xf32>
    %279 = arith.mulf %277, %278 : vector<8x32xf32>
    %cst_79 = arith.constant dense<0.000000e+00> : vector<32xf32>
    %280 = vector.multi_reduction <add>, %279, %cst_79 [0] : vector<8x32xf32> to vector<32xf32>
    %281 = vector.shape_cast %280 : vector<32xf32> to vector<1x32xf32>
    %cst_80 = arith.constant 5.000000e-01 : f32
    %282 = vector.broadcast %cst_80 : f32 to vector<1x32xf32>
    %283 = arith.mulf %281, %282 : vector<1x32xf32>
    %284 = vector.broadcast %283 : vector<1x32xf32> to vector<8x32xf32>
    %285 = arith.subf %279, %284 : vector<8x32xf32>
    %286 = vector.broadcast %11 : vector<8x1xf32> to vector<8x32xf32>
    %287 = arith.mulf %285, %286 : vector<8x32xf32>
    %288 = arith.mulf %287, %287 : vector<8x32xf32>
    %cst_81 = arith.constant dense<0.000000e+00> : vector<32xf32>
    %289 = vector.multi_reduction <add>, %288, %cst_81 [0] : vector<8x32xf32> to vector<32xf32>
    %290 = vector.shape_cast %289 : vector<32xf32> to vector<1x32xf32>
    %cst_82 = arith.constant 5.000000e-01 : f32
    %291 = vector.broadcast %cst_82 : f32 to vector<1x32xf32>
    %292 = arith.mulf %290, %291 : vector<1x32xf32>
    %cst_83 = arith.constant 9.99999993E-9 : f32
    %293 = vector.broadcast %cst_83 : f32 to vector<1x32xf32>
    %294 = arith.addf %292, %293 : vector<1x32xf32>
    %295 = math.sqrt %294 : vector<1x32xf32>
    %cst_84 = arith.constant dense<0.000000e+00> : vector<1xf32>
    %296 = vector.multi_reduction <add>, %295, %cst_84 [1] : vector<1x32xf32> to vector<1xf32>
    %297 = vector.shape_cast %296 : vector<1xf32> to vector<1x1xf32>
    %298 = arith.addf %276, %297 : vector<1x1xf32>
    %299 = vector.extract_strided_slice %6 {offsets = [104, 0], sizes = [8, 32], strides = [1, 1]} : vector<128x32xf32> to vector<8x32xf32>
    %300 = vector.broadcast %11 : vector<8x1xf32> to vector<8x32xf32>
    %301 = arith.mulf %299, %300 : vector<8x32xf32>
    %cst_85 = arith.constant dense<0.000000e+00> : vector<32xf32>
    %302 = vector.multi_reduction <add>, %301, %cst_85 [0] : vector<8x32xf32> to vector<32xf32>
    %303 = vector.shape_cast %302 : vector<32xf32> to vector<1x32xf32>
    %cst_86 = arith.constant 5.000000e-01 : f32
    %304 = vector.broadcast %cst_86 : f32 to vector<1x32xf32>
    %305 = arith.mulf %303, %304 : vector<1x32xf32>
    %306 = vector.broadcast %305 : vector<1x32xf32> to vector<8x32xf32>
    %307 = arith.subf %301, %306 : vector<8x32xf32>
    %308 = vector.broadcast %11 : vector<8x1xf32> to vector<8x32xf32>
    %309 = arith.mulf %307, %308 : vector<8x32xf32>
    %310 = arith.mulf %309, %309 : vector<8x32xf32>
    %cst_87 = arith.constant dense<0.000000e+00> : vector<32xf32>
    %311 = vector.multi_reduction <add>, %310, %cst_87 [0] : vector<8x32xf32> to vector<32xf32>
    %312 = vector.shape_cast %311 : vector<32xf32> to vector<1x32xf32>
    %cst_88 = arith.constant 5.000000e-01 : f32
    %313 = vector.broadcast %cst_88 : f32 to vector<1x32xf32>
    %314 = arith.mulf %312, %313 : vector<1x32xf32>
    %cst_89 = arith.constant 9.99999993E-9 : f32
    %315 = vector.broadcast %cst_89 : f32 to vector<1x32xf32>
    %316 = arith.addf %314, %315 : vector<1x32xf32>
    %317 = math.sqrt %316 : vector<1x32xf32>
    %cst_90 = arith.constant dense<0.000000e+00> : vector<1xf32>
    %318 = vector.multi_reduction <add>, %317, %cst_90 [1] : vector<1x32xf32> to vector<1xf32>
    %319 = vector.shape_cast %318 : vector<1xf32> to vector<1x1xf32>
    %320 = arith.addf %298, %319 : vector<1x1xf32>
    %321 = vector.extract_strided_slice %6 {offsets = [112, 0], sizes = [8, 32], strides = [1, 1]} : vector<128x32xf32> to vector<8x32xf32>
    %322 = vector.broadcast %11 : vector<8x1xf32> to vector<8x32xf32>
    %323 = arith.mulf %321, %322 : vector<8x32xf32>
    %cst_91 = arith.constant dense<0.000000e+00> : vector<32xf32>
    %324 = vector.multi_reduction <add>, %323, %cst_91 [0] : vector<8x32xf32> to vector<32xf32>
    %325 = vector.shape_cast %324 : vector<32xf32> to vector<1x32xf32>
    %cst_92 = arith.constant 5.000000e-01 : f32
    %326 = vector.broadcast %cst_92 : f32 to vector<1x32xf32>
    %327 = arith.mulf %325, %326 : vector<1x32xf32>
    %328 = vector.broadcast %327 : vector<1x32xf32> to vector<8x32xf32>
    %329 = arith.subf %323, %328 : vector<8x32xf32>
    %330 = vector.broadcast %11 : vector<8x1xf32> to vector<8x32xf32>
    %331 = arith.mulf %329, %330 : vector<8x32xf32>
    %332 = arith.mulf %331, %331 : vector<8x32xf32>
    %cst_93 = arith.constant dense<0.000000e+00> : vector<32xf32>
    %333 = vector.multi_reduction <add>, %332, %cst_93 [0] : vector<8x32xf32> to vector<32xf32>
    %334 = vector.shape_cast %333 : vector<32xf32> to vector<1x32xf32>
    %cst_94 = arith.constant 5.000000e-01 : f32
    %335 = vector.broadcast %cst_94 : f32 to vector<1x32xf32>
    %336 = arith.mulf %334, %335 : vector<1x32xf32>
    %cst_95 = arith.constant 9.99999993E-9 : f32
    %337 = vector.broadcast %cst_95 : f32 to vector<1x32xf32>
    %338 = arith.addf %336, %337 : vector<1x32xf32>
    %339 = math.sqrt %338 : vector<1x32xf32>
    %cst_96 = arith.constant dense<0.000000e+00> : vector<1xf32>
    %340 = vector.multi_reduction <add>, %339, %cst_96 [1] : vector<1x32xf32> to vector<1xf32>
    %341 = vector.shape_cast %340 : vector<1xf32> to vector<1x1xf32>
    %342 = arith.addf %320, %341 : vector<1x1xf32>
    %343 = vector.extract_strided_slice %6 {offsets = [120, 0], sizes = [8, 32], strides = [1, 1]} : vector<128x32xf32> to vector<8x32xf32>
    %344 = vector.broadcast %11 : vector<8x1xf32> to vector<8x32xf32>
    %345 = arith.mulf %343, %344 : vector<8x32xf32>
    %cst_97 = arith.constant dense<0.000000e+00> : vector<32xf32>
    %346 = vector.multi_reduction <add>, %345, %cst_97 [0] : vector<8x32xf32> to vector<32xf32>
    %347 = vector.shape_cast %346 : vector<32xf32> to vector<1x32xf32>
    %cst_98 = arith.constant 5.000000e-01 : f32
    %348 = vector.broadcast %cst_98 : f32 to vector<1x32xf32>
    %349 = arith.mulf %347, %348 : vector<1x32xf32>
    %350 = vector.broadcast %349 : vector<1x32xf32> to vector<8x32xf32>
    %351 = arith.subf %345, %350 : vector<8x32xf32>
    %352 = vector.broadcast %11 : vector<8x1xf32> to vector<8x32xf32>
    %353 = arith.mulf %351, %352 : vector<8x32xf32>
    %354 = arith.mulf %353, %353 : vector<8x32xf32>
    %cst_99 = arith.constant dense<0.000000e+00> : vector<32xf32>
    %355 = vector.multi_reduction <add>, %354, %cst_99 [0] : vector<8x32xf32> to vector<32xf32>
    %356 = vector.shape_cast %355 : vector<32xf32> to vector<1x32xf32>
    %cst_100 = arith.constant 5.000000e-01 : f32
    %357 = vector.broadcast %cst_100 : f32 to vector<1x32xf32>
    %358 = arith.mulf %356, %357 : vector<1x32xf32>
    %cst_101 = arith.constant 9.99999993E-9 : f32
    %359 = vector.broadcast %cst_101 : f32 to vector<1x32xf32>
    %360 = arith.addf %358, %359 : vector<1x32xf32>
    %361 = math.sqrt %360 : vector<1x32xf32>
    %cst_102 = arith.constant dense<0.000000e+00> : vector<1xf32>
    %362 = vector.multi_reduction <add>, %361, %cst_102 [1] : vector<1x32xf32> to vector<1xf32>
    %363 = vector.shape_cast %362 : vector<1xf32> to vector<1x1xf32>
    %364 = arith.addf %342, %363 : vector<1x1xf32>
    %cst_103 = arith.constant 0.001953125 : f32
    %365 = vector.broadcast %cst_103 : f32 to vector<1x1xf32>
    %366 = arith.mulf %364, %365 : vector<1x1xf32>
    %c0_104 = arith.constant 0 : index
    %c0_105 = arith.constant 0 : index
    %367 = vector.load %arg3[%c0_104, %c0_105] : memref<1x1xf32, #tpu.memory_space<vmem>>, vector<1x1xf32>
    tpu.vector_store %arg3[%c0_104, %c0_105], %366 {strides = array<i32>} : memref<1x1xf32, #tpu.memory_space<vmem>>, vector<1x1xf32>,
    return
  }
}

</mosaic_0001>

<bundles_post_ra>
// kernel: tpu_custom_call.1
= control target key start
LH: loop header
LB: loop body
LE: loop exit
PB: predicated region body
PF: predicated region fallthrough
CT: control target
= control target key end

     0   :  { %vm39_vm0 = vcmask 64512   ;;  %s1334_s0 = inlined_call_operand.vmem [shape: f32[16,8,8], index: 0, kind: input, shape index: {}]   ;;  %s1335_s1 = inlined_call_operand.vmem [shape: f32[8,32], index: 1, kind: input, shape index: {}]   ;;  %s1336_s2 = inlined_call_operand.vmem [shape: f32[1,32], index: 2, kind: input, shape index: {}]   ;;  %s1337_s3 = inlined_call_operand.hbm [shape: f32[1,1], index: 3, kind: output, shape index: {}]  }
   0x1   :  { %v31_v0 = vld [vmem:[%s1335_s1] sm:$0xff]  ;;  %v16_v3 = vld [vmem:[%s1334_s0 + $0x8] sm:$0xff]  ;;  %v17_v5 = vld [vmem:[%s1334_s0 + $0x10] sm:$0xff] }
   0x2   :  { %v15_v1 = vld [vmem:[%s1334_s0] sm:$0xff]  ;;  %803 = vmatprep.subr.mxu0 %v31_v0  ;;  %829 = vmatprep.subr.mxu1 %v31_v0  ;;  %v24_v4 = vld [vmem:[%s1334_s0 + $0x48] sm:$0xff]  ;;  %v25_v6 = vld [vmem:[%s1334_s0 + $0x50] sm:$0xff] }
   0x3   :  { %v23_v2 = vld [vmem:[%s1334_s0 + $0x40] sm:$0xff]  ;;  %804 = vmatpush3.msra.mxu0 %v31_v0  ;;  %830 = vmatpush3.msra.mxu1 %v31_v0  ;;  %v18_v7 = vld [vmem:[%s1334_s0 + $0x18] sm:$0xff] }
   0x4   :  { %805 = vmatprep.mubr.msk.f32.mxu0 %vm39_vm0, %v15_v1  ;;  %817 = vmatprep.mubr.msk.f32.mxu1 %vm39_vm0, %v23_v2  ;;  %v26_v8 = vld [vmem:[%s1334_s0 + $0x58] sm:$0xff] }
   0x5   :  { %806 = vmatmul.mubr.msk.f32.vlgmr.msra.gmra.mxu0 %vm39_vm0, %v16_v3  ;;  %818 = vmatmul.mubr.msk.f32.vlgmr.msra.gmra.mxu1 %vm39_vm0, %v24_v4 }
   0x6   :  { %808 = vmatprep.mubr.msk.f32.mxu0 %vm39_vm0, %v17_v5  ;;  %820 = vmatprep.mubr.msk.f32.mxu1 %vm39_vm0, %v25_v6 }
   0x7   :  { %8 = vsyncpa [#allocation3], 0  ;;  %v19_v9 = vld [vmem:[%s1334_s0 + $0x20] sm:$0xff]  ;;  %v20_v11 = vld [vmem:[%s1334_s0 + $0x28] sm:$0xff]  ;;  %v233_v17 = vlaneseq  ;;  %v887_v21 = vmov 0.0   ;;  %vm239_vm2 = vcmask 261120  }
   0x8   :  { %v27_v10 = vld [vmem:[%s1334_s0 + $0x60] sm:$0xff]  ;;  %v28_v12 = vld [vmem:[%s1334_s0 + $0x68] sm:$0xff]  ;;  %v21_v13 = vld [vmem:[%s1334_s0 + $0x30] sm:$0xff] }
   0x9   :  { %809 = vmatmul.mubr.msk.f32.gmra.mxu0 %vm39_vm0, %v18_v7  ;;  %821 = vmatmul.mubr.msk.f32.gmra.mxu1 %vm39_vm0, %v26_v8  ;;  %v29_v14 = vld [vmem:[%s1334_s0 + $0x70] sm:$0xff]  ;;  %v22_v15 = vld [vmem:[%s1334_s0 + $0x38] sm:$0xff]  ;;  %v234_v18 = vshrl.u32 %v233_v17, 7  ;;  %v979_v19 = vld [vmem:[%s1336_s2] ss:$0 sm:$0xff] }
   0xa   :  { %811 = vmatprep.mubr.msk.f32.mxu0 %vm39_vm0, %v19_v9  ;;  %823 = vmatprep.mubr.msk.f32.mxu1 %vm39_vm0, %v27_v10  ;;  %v30_v16 = vld [vmem:[%s1334_s0 + $0x78] sm:$0xff]  ;;  %s888_s0 = smov [#allocation2]  }
   0xb   :  { %vm235_vm1 = vcmp.lt.s32.totalorder %v234_v18, 2  ;;  %s760_s2 = sshll.u32 %s888_s0, 4  ;;  %s761_s2 = int_to_ptr.vmem [resolvable:$true] %s760_s2 }
   0xc   :  { %v981_v22 = vsel %vm235_vm1, 1.0, %v887_v21  ;;  %s865_s20 = scalar_lea.vmem %s761_s2, 16  ;;  %s869_s21 = scalar_lea.vmem %s761_s2, 32 }
   0xd   :  { %812 = vmatmul.mubr.msk.f32.gmra.mxu0 %vm39_vm0, %v20_v11  ;;  %824 = vmatmul.mubr.msk.f32.gmra.mxu1 %vm39_vm0, %v28_v12  ;;  %p866_p0 = scmp.ne.s32.totalorder %s761_s2, %s865_s20  ;;  %p870_p1 = scmp.lt.s32.totalorder %s761_s2, %s761_s2 }
   0xe   :  { %814 = vmatprep.mubr.msk.f32.mxu0 %vm39_vm0, %v21_v13  ;;  %826 = vmatprep.mubr.msk.f32.mxu1 %vm39_vm0, %v29_v14  ;;  %p871_p2 = scmp.lt.s32.totalorder %s869_s21, %s865_s20 }
  0x10   :  { %p872_p3 = por %p871_p2, %p870_p1 }
  0x11   :  { %815 = vmatmul.mubr.msk.f32.gmra.mxu0 %vm39_vm0, %v22_v15  ;;  %827 = vmatmul.mubr.msk.f32.gmra.mxu1 %vm39_vm0, %v30_v16 }
  0x12   :  { %p873_p4 = pnand %p872_p3, %p866_p0 }
  0xc5   :  { %v807_v20 = vpop.f32.mrf.mxu0  ;;  %v819_v23 = vpop.f32.mrf.mxu1 }
  0xc6   :  { %v160_v24 = vadd.f32 %v807_v20, %v979_v19  ;;  %v200_v25 = vadd.f32 %v819_v23, %v979_v19 }
  0xc7   :  { %v154_v26 = vpop.f32.mrf.mxu0  ;;  %v194_v27 = vpop.f32.mrf.mxu1 }
  0xc8   :  { %v986_v28 = vmul.f32 %v981_v22, %v160_v24  ;;  %v989_v29 = vmul.f32 %v981_v22, %v200_v25  ;;  %v155_v30 = vadd.f32 %v979_v19, %v154_v26  ;;  %v195_v31 = vadd.f32 %v979_v19, %v194_v27 }
  0xc9   :  { %v810_v32 = vpop.f32.mrf.mxu0  ;;  %v822_v33 = vpop.f32.mrf.mxu1 }
  0xca   :  { %v272_v34 = vsel %vm239_vm2, %v986_v28, 0.0  ;;  %v528_v35 = vsel %vm239_vm2, %v989_v29, 0.0  ;;  %v998_v36 = vmul.f32 %v981_v22, %v155_v30  ;;  %v1001_v37 = vmul.f32 %v981_v22, %v195_v31 }
  0xcb   :  { %v273_v38 = vrot.slane %v272_v34, 4  ;;  %v529_v39 = vrot.slane %v528_v35, 4  ;;  %v170_v40 = vadd.f32 %v810_v32, %v979_v19  ;;  %v210_v41 = vadd.f32 %v822_v33, %v979_v19  ;;  %v164_v42 = vpop.f32.mrf.mxu0  ;;  %v204_v43 = vpop.f32.mrf.mxu1 }
  0xcc   :  { %v240_v44 = vsel %vm239_vm2, %v998_v36, 0.0  ;;  %v496_v45 = vsel %vm239_vm2, %v1001_v37, 0.0  ;;  %v165_v46 = vadd.f32 %v979_v19, %v164_v42  ;;  %v205_v47 = vadd.f32 %v979_v19, %v204_v43 }
  0xcd   :  { %v274_v48 = vadd.f32 %v273_v38, %v272_v34  ;;  %v530_v49 = vadd.f32 %v529_v39, %v528_v35  ;;  %v241_v50 = vrot.slane %v240_v44, 4  ;;  %v497_v51 = vrot.slane %v496_v45, 4 }
  0xce   :  { %v1012_v52 = vmul.f32 %v981_v22, %v170_v40  ;;  %v1015_v53 = vmul.f32 %v981_v22, %v210_v41  ;;  %v1018_v54 = vmul.f32 %v981_v22, %v165_v46  ;;  %v1021_v55 = vmul.f32 %v981_v22, %v205_v47 }
  0xcf   :  { %v275_v56 = vrot.slane %v274_v48, 2  ;;  %v531_v57 = vrot.slane %v530_v49, 2  ;;  %v242_v58 = vadd.f32 %v241_v50, %v240_v44  ;;  %v498_v59 = vadd.f32 %v497_v51, %v496_v45 }
  0xd0   :  { %v336_v60 = vsel %vm239_vm2, %v1012_v52, 0.0  ;;  %v592_v61 = vsel %vm239_vm2, %v1015_v53, 0.0  ;;  %v304_v62 = vsel %vm239_vm2, %v1018_v54, 0.0  ;;  %v560_v63 = vsel %vm239_vm2, %v1021_v55, 0.0 }
  0xd1   :  { %v276_v0 = vadd.f32 %v275_v56, %v274_v48  ;;  %v532_v1 = vadd.f32 %v531_v57, %v530_v49  ;;  %v243_v2 = vrot.slane %v242_v58, 2  ;;  %v499_v3 = vrot.slane %v498_v59, 2 }
  0xd2   :  { %v337_v4 = vrot.slane %v336_v60, 4  ;;  %v593_v5 = vrot.slane %v592_v61, 4  ;;  %v305_v6 = vrot.slane %v304_v62, 4  ;;  %v561_v7 = vrot.slane %v560_v63, 4 }
  0xd3   :  { %v277_v8 = vrot.slane %v276_v0, 1  ;;  %v533_v9 = vrot.slane %v532_v1, 1  ;;  %v244_v10 = vadd.f32 %v243_v2, %v242_v58  ;;  %v500_v11 = vadd.f32 %v499_v3, %v498_v59 }
  0xd4   :  { %v338_v12 = vadd.f32 %v337_v4, %v336_v60  ;;  %v594_v13 = vadd.f32 %v593_v5, %v592_v61  ;;  %v306_v14 = vadd.f32 %v305_v6, %v304_v62  ;;  %v562_v15 = vadd.f32 %v561_v7, %v560_v63 }
  0xd5   :  { %v278_v16 = vadd.f32 %v277_v8, %v276_v0  ;;  %v534_v17 = vadd.f32 %v533_v9, %v532_v1  ;;  %v245_v18 = vrot.slane %v244_v10, 1  ;;  %v501_v20 = vrot.slane %v500_v11, 1 }
  0xd6   :  { %v339_v21 = vrot.slane %v338_v12, 2  ;;  %v595_v23 = vrot.slane %v594_v13, 2  ;;  %v307_v24 = vrot.slane %v306_v14, 2  ;;  %v563_v25 = vrot.slane %v562_v15, 2 }
  0xd7   :  { %v279_v26 = vmul.f32 0.5, %v278_v16  ;;  %v535_v27 = vmul.f32 0.5, %v534_v17  ;;  %v246_v30 = vadd.f32 %v245_v18, %v244_v10  ;;  %v502_v31 = vadd.f32 %v501_v20, %v500_v11 }
  0xd8   :  { %v340_v32 = vadd.f32 %v339_v21, %v338_v12  ;;  %v596_v33 = vadd.f32 %v595_v23, %v594_v13  ;;  %v308_v34 = vadd.f32 %v307_v24, %v306_v14  ;;  %v564_v35 = vadd.f32 %v563_v25, %v562_v15 }
  0xd9   :  { %v280_v38 = vsub.f32 %v986_v28, %v279_v26  ;;  %v536_v39 = vsub.f32 %v989_v29, %v535_v27  ;;  %v247_v40 = vmul.f32 0.5, %v246_v30  ;;  %v503_v41 = vmul.f32 0.5, %v502_v31 }
  0xda   :  { %v341_v42 = vrot.slane %v340_v32, 1  ;;  %v597_v43 = vrot.slane %v596_v33, 1  ;;  %v309_v44 = vrot.slane %v308_v34, 1  ;;  %v565_v45 = vrot.slane %v564_v35, 1 }
  0xdb   :  { %v281_v46 = vmul.f32 %v981_v22, %v280_v38  ;;  %v537_v47 = vmul.f32 %v981_v22, %v536_v39  ;;  %v248_v48 = vsub.f32 %v998_v36, %v247_v40  ;;  %v504_v49 = vsub.f32 %v1001_v37, %v503_v41  ;;  %v813_v39 = vpop.f32.mrf.mxu0 }
  0xdc   :  { %v342_v50 = vadd.f32 %v341_v42, %v340_v32  ;;  %v598_v51 = vadd.f32 %v597_v43, %v596_v33  ;;  %v310_v56 = vadd.f32 %v309_v44, %v308_v34  ;;  %v566_v28 = vadd.f32 %v565_v45, %v564_v35  ;;  %v825_v44 = vpop.f32.mrf.mxu1 }
  0xdd   :  { %v282_v57 = vmul.f32 %v281_v46, %v281_v46  ;;  %v538_v29 = vmul.f32 %v537_v47, %v537_v47  ;;  %v249_v58 = vmul.f32 %v981_v22, %v248_v48  ;;  %v505_v59 = vmul.f32 %v981_v22, %v504_v49 }
  0xde   :  { %v343_v60 = vmul.f32 0.5, %v342_v50  ;;  %v599_v61 = vmul.f32 0.5, %v598_v51  ;;  %v311_v62 = vmul.f32 0.5, %v310_v56  ;;  %v567_v63 = vmul.f32 0.5, %v566_v28  ;;  %v174_v50 = vpop.f32.mrf.mxu0 }
  0xdf   :  { %v283_v0 = vsel %vm239_vm2, %v282_v57, 0.0  ;;  %v539_v36 = vsel %vm239_vm2, %v538_v29, 0.0  ;;  %v250_v1 = vmul.f32 %v249_v58, %v249_v58  ;;  %v506_v37 = vmul.f32 %v505_v59, %v505_v59  ;;  %v214_v29 = vpop.f32.mrf.mxu1 }
  0xe0   :  { %v284_v2 = vrot.slane %v283_v0, 4  ;;  %v540_v3 = vrot.slane %v539_v36, 4  ;;  %v344_v4 = vsub.f32 %v1012_v52, %v343_v60  ;;  %v600_v5 = vsub.f32 %v1015_v53, %v599_v61 }
  0xe1   :  { %v251_v6 = vsel %vm239_vm2, %v250_v1, 0.0  ;;  %v507_v7 = vsel %vm239_vm2, %v506_v37, 0.0  ;;  %v312_v8 = vsub.f32 %v1018_v54, %v311_v62  ;;  %v568_v9 = vsub.f32 %v1021_v55, %v567_v63 }
  0xe2   :  { %v285_v10 = vadd.f32 %v284_v2, %v283_v0  ;;  %v252_v11 = vrot.slane %v251_v6, 4  ;;  %v508_v12 = vrot.slane %v507_v7, 4  ;;  %v345_v13 = vmul.f32 %v981_v22, %v344_v4  ;;  %v816_v2 = vpop.f32.mrf.mxu0 }
  0xe3   :  { %v601_v14 = vmul.f32 %v981_v22, %v600_v5  ;;  %v313_v15 = vmul.f32 %v981_v22, %v312_v8  ;;  %v569_v52 = vmul.f32 %v981_v22, %v568_v9  ;;  %v541_v16 = vadd.f32 %v540_v3, %v539_v36 }
  0xe4   :  { %v286_v53 = vrot.slane %v285_v10, 2  ;;  %v253_v17 = vadd.f32 %v252_v11, %v251_v6  ;;  %v509_v18 = vadd.f32 %v508_v12, %v507_v7  ;;  %v346_v20 = vmul.f32 %v345_v13, %v345_v13  ;;  %v828_v7 = vpop.f32.mrf.mxu1 }
  0xe5   :  { %v602_v21 = vmul.f32 %v601_v14, %v601_v14  ;;  %v314_v54 = vmul.f32 %v313_v15, %v313_v15  ;;  %v570_v23 = vmul.f32 %v569_v52, %v569_v52  ;;  %v542_v27 = vrot.slane %v541_v16, 2 }
  0xe6   :  { %v287_v55 = vadd.f32 %v286_v53, %v285_v10  ;;  %v254_v24 = vrot.slane %v253_v17, 2  ;;  %v347_v25 = vsel %vm239_vm2, %v346_v20, 0.0  ;;  %v510_v30 = vrot.slane %v509_v18, 2 }
  0xe7   :  { %v315_v26 = vsel %vm239_vm2, %v314_v54, 0.0  ;;  %v603_v31 = vsel %vm239_vm2, %v602_v21, 0.0  ;;  %v571_v32 = vsel %vm239_vm2, %v570_v23, 0.0  ;;  %v348_v35 = vrot.slane %v347_v25, 4 }
  0xe8   :  { %v288_v33 = vrot.slane %v287_v55, 1  ;;  %v255_v34 = vadd.f32 %v254_v24, %v253_v17  ;;  %v316_v38 = vrot.slane %v315_v26, 4  ;;  %v604_v41 = vrot.slane %v603_v31, 4 }
  0xe9   :  { %v349_v40 = vadd.f32 %v348_v35, %v347_v25  ;;  %v572_v43 = vrot.slane %v571_v32, 4  ;;  %v543_v45 = vadd.f32 %v542_v27, %v541_v16  ;;  %v511_v48 = vadd.f32 %v510_v30, %v509_v18  ;;  %v184_v18 = vpop.f32.mrf.mxu0 }
  0xea   :  { %v317_v42 = vadd.f32 %v316_v38, %v315_v26  ;;  %v289_v46 = vadd.f32 %v288_v33, %v287_v55  ;;  %v256_v47 = vrot.slane %v255_v34, 1  ;;  %v605_v56 = vadd.f32 %v604_v41, %v603_v31  ;;  %v224_v55 = vpop.f32.mrf.mxu1 }
  0xeb   :  { %v350_v51 = vrot.slane %v349_v40, 2  ;;  %v573_v57 = vadd.f32 %v572_v43, %v571_v32  ;;  %v180_v58 = vadd.f32 %v813_v39, %v979_v19  ;;  %v220_v59 = vadd.f32 %v825_v44, %v979_v19 }
  0xec   :  { %v318_v49 = vrot.slane %v317_v42, 2  ;;  %v290_v60 = vmul.f32 0.5, %v289_v46  ;;  %v544_v61 = vrot.slane %v543_v45, 1  ;;  %v257_v62 = vadd.f32 %v256_v47, %v255_v34 }
  0xed   :  { %v512_v63 = vrot.slane %v511_v48, 1  ;;  %v1058_v0 = vmul.f32 %v981_v22, %v180_v58  ;;  %v1061_v36 = vmul.f32 %v981_v22, %v220_v59  ;;  %v175_v1 = vadd.f32 %v979_v19, %v174_v50 }
  0xee   :  { %v319_v28 = vadd.f32 %v318_v49, %v317_v42  ;;  %v215_v37 = vadd.f32 %v979_v19, %v214_v29  ;;  %v1065_v3 = vadd.f32 %v350_v51, %v349_v40  ;;  %v606_v4 = vrot.slane %v605_v56, 2 }
  0xef   :  { %v574_v6 = vrot.slane %v573_v57, 2  ;;  %v400_v8 = vsel %vm239_vm2, %v1058_v0, 0.0  ;;  %v656_v9 = vsel %vm239_vm2, %v1061_v36, 0.0  ;;  %v1072_v10 = vmul.f32 %v981_v22, %v175_v1 }
  0xf0   :  { %v320_v5 = vrot.slane %v319_v28, 1  ;;  %v1075_v11 = vmul.f32 %v981_v22, %v215_v37  ;;  %v1077_v12 = vadd.f32 1e-08, %v290_v60  ;;  %v1079_v13 = vadd.f32 %v544_v61, %v543_v45 }
  0xf1   :  { %v1081_v14 = vmul.f32 0.5, %v257_v62  ;;  %v1083_v15 = vadd.f32 %v512_v63, %v511_v48  ;;  %v401_v52 = vrot.slane %v400_v8, 4  ;;  %v657_v53 = vrot.slane %v656_v9, 4 }
  0xf2   :  { %v368_v16 = vsel %vm239_vm2, %v1072_v10, 0.0  ;;  %v624_v17 = vsel %vm239_vm2, %v1075_v11, 0.0  ;;  %v352_v20 = vrot.slane %v1065_v3, 1  ;;  %v1090_v21 = vadd.f32 %v606_v4, %v605_v56 }
  0xf3   :  { %v1092_v54 = vadd.f32 %v574_v6, %v573_v57  ;;  %v190_v23 = vadd.f32 %v816_v2, %v979_v19  ;;  %v1095_v24 = vadd.f32 %v320_v5, %v319_v28  ;;  %v402_v25 = vadd.f32 %v401_v52, %v400_v8 }
  0xf4   :  { %v658_v26 = vadd.f32 %v657_v53, %v656_v9  ;;  %v369_v27 = vrot.slane %v368_v16, 4  ;;  %v625_v30 = vrot.slane %v624_v17, 4  ;;  %v230_v32 = vadd.f32 %v828_v7, %v979_v19 }
  0xf5   :  { %v1098_v31 = vmul.f32 %v981_v22, %v190_v23  ;;  %v185_v33 = vadd.f32 %v979_v19, %v184_v18  ;;  %v403_v34 = vrot.slane %v402_v25, 2  ;;  %v225_v39 = vadd.f32 %v979_v19, %v224_v55 }
  0xf6   :  { %v659_v35 = vrot.slane %v658_v26, 2  ;;  %v370_v38 = vadd.f32 %v369_v27, %v368_v16  ;;  %v626_v40 = vadd.f32 %v625_v30, %v624_v17  ;;  %v1106_v42 = vmul.f32 %v981_v22, %v230_v32 }
  0xf7   :  { %v464_v41 = vsel %vm239_vm2, %v1098_v31, 0.0  ;;  %v1109_v43 = vmul.f32 %v981_v22, %v185_v33  ;;  %v404_v44 = vadd.f32 %v403_v34, %v402_v25  ;;  %v1116_v50 = vmul.f32 %v981_v22, %v225_v39 }
  0xf8   :  { %v660_v45 = vadd.f32 %v659_v35, %v658_v26  ;;  %v371_v46 = vrot.slane %v370_v38, 2  ;;  %v465_v47 = vrot.slane %v464_v41, 4  ;;  %v627_v48 = vrot.slane %v626_v40, 2 }
  0xf9   :  { %v720_v49 = vsel %vm239_vm2, %v1106_v42, 0.0  ;;  %v432_v19 = vsel %vm239_vm2, %v1109_v43, 0.0  ;;  %v405_v51 = vrot.slane %v404_v44, 1  ;;  %v688_v60 = vsel %vm239_vm2, %v1116_v50, 0.0 }
  0xfa   :  { %v661_v56 = vrot.slane %v660_v45, 1  ;;  %v372_v28 = vadd.f32 %v371_v46, %v370_v38  ;;  %v466_v57 = vadd.f32 %v465_v47, %v464_v41  ;;  %v628_v29 = vadd.f32 %v627_v48, %v626_v40 }
  0xfb   :  { %v721_v58 = vrot.slane %v720_v49, 4  ;;  %v433_v59 = vrot.slane %v432_v19, 4  ;;  %v406_v61 = vadd.f32 %v405_v51, %v404_v44  ;;  %v689_v5 = vrot.slane %v688_v60, 4 }
  0xfc   :  { %v662_v62 = vadd.f32 %v661_v56, %v660_v45  ;;  %v373_v63 = vrot.slane %v372_v28, 1  ;;  %v467_v1 = vrot.slane %v466_v57, 2  ;;  %v629_v37 = vrot.slane %v628_v29, 1 }
  0xfd   :  { %v722_v2 = vadd.f32 %v721_v58, %v720_v49  ;;  %v434_v4 = vadd.f32 %v433_v59, %v432_v19  ;;  %v407_v6 = vmul.f32 0.5, %v406_v61  ;;  %v690_v17 = vadd.f32 %v689_v5, %v688_v60 }
  0xfe   :  { %v663_v7 = vmul.f32 0.5, %v662_v62  ;;  %v374_v8 = vadd.f32 %v373_v63, %v372_v28  ;;  %v468_v9 = vadd.f32 %v467_v1, %v466_v57  ;;  %v630_v52 = vadd.f32 %v629_v37, %v628_v29 }
  0xff   :  { %v723_v53 = vrot.slane %v722_v2, 2  ;;  %v435_v16 = vrot.slane %v434_v4, 2  ;;  %v408_v18 = vsub.f32 %v1058_v0, %v407_v6  ;;  %v691_v32 = vrot.slane %v690_v17, 2 }
 0x100   :  { %v664_v23 = vsub.f32 %v1061_v36, %v663_v7  ;;  %v375_v55 = vmul.f32 0.5, %v374_v8  ;;  %v469_v25 = vrot.slane %v468_v9, 1  ;;  %v631_v26 = vmul.f32 0.5, %v630_v52 }
 0x101   :  { %v724_v27 = vadd.f32 %v723_v53, %v722_v2  ;;  %v436_v30 = vadd.f32 %v435_v16, %v434_v4  ;;  %v409_v33 = vmul.f32 %v981_v22, %v408_v18  ;;  %v692_v0 = vadd.f32 %v691_v32, %v690_v17 }
 0x102   :  { %v665_v34 = vmul.f32 %v981_v22, %v664_v23  ;;  %v376_v35 = vsub.f32 %v1072_v10, %v375_v55  ;;  %v470_v38 = vadd.f32 %v469_v25, %v468_v9  ;;  %v632_v39 = vsub.f32 %v1075_v11, %v631_v26 }
 0x103   :  { %v725_v40 = vrot.slane %v724_v27, 1  ;;  %v437_v41 = vrot.slane %v436_v30, 1  ;;  %v410_v44 = vmul.f32 %v409_v33, %v409_v33  ;;  %v693_v19 = vrot.slane %v692_v0, 1 }
 0x104   :  { %v666_v36 = vmul.f32 %v665_v34, %v665_v34  ;;  %v377_v45 = vmul.f32 %v981_v22, %v376_v35  ;;  %v471_v46 = vmul.f32 0.5, %v470_v38  ;;  %v633_v47 = vmul.f32 %v981_v22, %v632_v39 }
 0x105   :  { %v726_v48 = vadd.f32 %v725_v40, %v724_v27  ;;  %v438_v49 = vadd.f32 %v437_v41, %v436_v30  ;;  %v411_v51 = vsel %vm239_vm2, %v410_v44, 0.0  ;;  %v694_v62 = vadd.f32 %v693_v19, %v692_v0 }
 0x106   :  { %v667_v10 = vsel %vm239_vm2, %v666_v36, 0.0  ;;  %v378_v56 = vmul.f32 %v377_v45, %v377_v45  ;;  %v472_v11 = vsub.f32 %v1098_v31, %v471_v46  ;;  %v412_v28 = vrot.slane %v411_v51, 4 }
 0x107   :  { %v668_v57 = vrot.slane %v667_v10, 4  ;;  %v634_v29 = vmul.f32 %v633_v47, %v633_v47  ;;  %v727_v58 = vmul.f32 0.5, %v726_v48  ;;  %v439_v61 = vmul.f32 0.5, %v438_v49 }
 0x108   :  { %v379_v59 = vsel %vm239_vm2, %v378_v56, 0.0  ;;  %v473_v60 = vmul.f32 %v981_v22, %v472_v11  ;;  %v413_v63 = vadd.f32 %v412_v28, %v411_v51  ;;  %v695_v52 = vmul.f32 0.5, %v694_v62 }
 0x109   :  { %v669_v1 = vadd.f32 %v668_v57, %v667_v10  ;;  %v380_v37 = vrot.slane %v379_v59, 4  ;;  %v635_v2 = vsel %vm239_vm2, %v634_v29, 0.0  ;;  %v728_v6 = vsub.f32 %v1106_v42, %v727_v58 }
 0x10a   :  { %v636_v4 = vrot.slane %v635_v2, 4  ;;  %v474_v5 = vmul.f32 %v473_v60, %v473_v60  ;;  %v440_v31 = vsub.f32 %v1109_v43, %v439_v61  ;;  %v414_v7 = vrot.slane %v413_v63, 2 }
 0x10b   :  { %v670_v8 = vrot.slane %v669_v1, 2  ;;  %v381_v9 = vadd.f32 %v380_v37, %v379_v59  ;;  %v729_v17 = vmul.f32 %v981_v22, %v728_v6  ;;  %v1140_v23 = vadd.f32 1e-08, %v1081_v14 }
 0x10c   :  { %v637_v53 = vadd.f32 %v636_v4, %v635_v2  ;;  %v475_v16 = vsel %vm239_vm2, %v474_v5, 0.0  ;;  %v441_v18 = vmul.f32 %v981_v22, %v440_v31  ;;  %v415_v55 = vadd.f32 %v414_v7, %v413_v63 }
 0x10d   :  { %v382_v25 = vrot.slane %v381_v9, 2  ;;  %v476_v26 = vrot.slane %v475_v16, 4  ;;  %v730_v27 = vmul.f32 %v729_v17, %v729_v17  ;;  %v696_v30 = vsub.f32 %v1116_v50, %v695_v52 }
 0x10e   :  { %v638_v42 = vrot.slane %v637_v53, 2  ;;  %v442_v43 = vmul.f32 %v441_v18, %v441_v18  ;;  %v353_v32 = vadd.f32 %v352_v20, %v1065_v3  ;;  %v322_v33 = vmul.f32 0.5, %v1095_v24 }
 0x10f   :  { %v383_v34 = vadd.f32 %v382_v25, %v381_v9  ;;  %v477_v35 = vadd.f32 %v476_v26, %v475_v16  ;;  %v671_v38 = vadd.f32 %v670_v8, %v669_v1  ;;  %v731_v14 = vsel %vm239_vm2, %v730_v27, 0.0 }
 0x110   :  { %v443_v39 = vsel %vm239_vm2, %v442_v43, 0.0  ;;  %v697_v40 = vmul.f32 %v981_v22, %v696_v30  ;;  %v416_v41 = vrot.slane %v415_v55, 1  ;;  %v639_v44 = vadd.f32 %v638_v42, %v637_v53 }
 0x111   :  { %v384_v0 = vrot.slane %v383_v34, 1  ;;  %v478_v36 = vrot.slane %v477_v35, 2  ;;  %v608_v50 = vrot.slane %v1090_v21, 1  ;;  %v732_v45 = vrot.slane %v731_v14, 4 }
 0x112   :  { %v444_v46 = vrot.slane %v443_v39, 4  ;;  %v698_v3 = vmul.f32 %v697_v40, %v697_v40  ;;  %v354_v20 = vmul.f32 0.5, %v353_v32  ;;  %v576_v24 = vrot.slane %v1092_v54, 1 }
 0x113   :  { %v385_v47 = vadd.f32 %v384_v0, %v383_v34  ;;  %v479_v48 = vadd.f32 %v478_v36, %v477_v35  ;;  %v1152_v49 = vadd.f32 1e-08, %v322_v33  ;;  %v733_v19 = vadd.f32 %v732_v45, %v731_v14 }
 0x114   :  { %v445_v51 = vadd.f32 %v444_v46, %v443_v39  ;;  %v699_v22 = vsel %vm239_vm2, %v698_v3, 0.0  ;;  %v417_v10 = vadd.f32 %v416_v41, %v415_v55  ;;  %v672_v56 = vrot.slane %v671_v38, 1 }
 0x115   :  { %v640_v11 = vrot.slane %v639_v44, 1  ;;  %v480_v28 = vrot.slane %v479_v48, 1  ;;  %v609_v57 = vadd.f32 %v608_v50, %v1090_v21  ;;  %v734_v29 = vrot.slane %v733_v19, 2 }
 0x116   :  { %v446_v58 = vrot.slane %v445_v51, 2  ;;  %v700_v59 = vrot.slane %v699_v22, 4  ;;  %v577_v60 = vadd.f32 %v576_v24, %v1092_v54  ;;  %v386_v61 = vmul.f32 0.5, %v385_v47 }
 0x117   :  { %v481_v62 = vadd.f32 %v480_v28, %v479_v48  ;;  %833 = vrsqrt.f32 %v1140_v23  ;;  %v1158_v63 = vadd.f32 1e-08, %v354_v20  ;;  %v735_v1 = vadd.f32 %v734_v29, %v733_v19 }
 0x118   :  { %v447_v37 = vadd.f32 %v446_v58, %v445_v51  ;;  %v701_v2 = vadd.f32 %v700_v59, %v699_v22  ;;  %v418_v4 = vmul.f32 0.5, %v417_v10  ;;  %v673_v5 = vadd.f32 %v672_v56, %v671_v38 }
 0x119   :  { %v641_v6 = vadd.f32 %v640_v11, %v639_v44  ;;  %835 = vrsqrt.f32 %v1152_v49  ;;  %v546_v21 = vmul.f32 0.5, %v1079_v13  ;;  %v514_v31 = vmul.f32 0.5, %v1083_v15 }
 0x11a   :  { %v448_v7 = vrot.slane %v447_v37, 1  ;;  %v702_v54 = vrot.slane %v701_v2, 2  ;;  %v610_v8 = vmul.f32 0.5, %v609_v57  ;;  %v1163_v9 = vadd.f32 1e-08, %v386_v61 }
 0x11b   :  { %v482_v52 = vmul.f32 0.5, %v481_v62  ;;  %837 = vrsqrt.f32 %v1077_v12  ;;  %v578_v53 = vmul.f32 0.5, %v577_v60  ;;  %v736_v16 = vrot.slane %v735_v1, 1 }
 0x11c   :  { %v449_v17 = vadd.f32 %v448_v7, %v447_v37  ;;  %v703_v18 = vadd.f32 %v702_v54, %v701_v2  ;;  %v1166_v55 = vadd.f32 1e-08, %v418_v4  ;;  %v674_v25 = vmul.f32 0.5, %v673_v5 }
 0x11d   :  { %v642_v26 = vmul.f32 0.5, %v641_v6  ;;  %839 = vrsqrt.f32 %v1158_v63  ;;  %v1169_v42 = vadd.f32 1e-08, %v546_v21  ;;  %v1171_v27 = vadd.f32 1e-08, %v514_v31 }
 0x11e   :  { %v450_v13 = vmul.f32 0.5, %v449_v17  ;;  %v704_v15 = vrot.slane %v703_v18, 1  ;;  %v1173_v43 = vadd.f32 1e-08, %v482_v52  ;;  %841 = vrsqrt.f32 %v1163_v9 }
 0x11f   :  { %v1176_v30 = vadd.f32 1e-08, %v610_v8  ;;  %v1178_v32 = vadd.f32 1e-08, %v578_v53  ;;  %v737_v33 = vadd.f32 %v736_v16, %v735_v1  ;;  %v1182_v35 = vadd.f32 1e-08, %v674_v25 }
 0x120   :  { %v1180_v34 = vadd.f32 1e-08, %v450_v13  ;;  %v1184_v38 = vadd.f32 1e-08, %v642_v26  ;;  %vm262_vm3 = vcmp.eq.f32.partialorder %v1140_v23, inf  ;;  %843 = vrsqrt.f32 %v1166_v55 }
 0x121   :  { %v705_v14 = vadd.f32 %v704_v15, %v703_v18  ;;  %vm264_vm4 = vcmp.eq.f32.partialorder %v1140_v23, 0.0  ;;  %v265_v39 = vand.u32 2147483648, %v1140_v23  ;;  %vm326_vm5 = vcmp.eq.f32.partialorder %v1152_v49, inf }
 0x122   :  { %845 = vrsqrt.f32 %v1180_v34  ;;  %vm328_vm6 = vcmp.eq.f32.partialorder %v1152_v49, 0.0  ;;  %v329_v40 = vand.u32 2147483648, %v1152_v49  ;;  %v738_v0 = vmul.f32 0.5, %v737_v33 }
 0x123   :  { %847 = vrsqrt.f32 %v1173_v43  ;;  %vm294_vm7 = vcmp.eq.f32.partialorder %v1077_v12, inf  ;;  %vm296_vm8 = vcmp.eq.f32.partialorder %v1077_v12, 0.0  ;;  %v297_v36 = vand.u32 2147483648, %v1077_v12 }
 0x124   :  { %v834_v41 = vpop.eup %833  ;;  %849 = vrsqrt.f32 %v1171_v27  ;;  %vm358_vm9 = vcmp.eq.f32.partialorder %v1158_v63, inf  ;;  %v706_v45 = vmul.f32 0.5, %v705_v14  ;;  %vm360_vm10 = vcmp.eq.f32.partialorder %v1158_v63, 0.0 }
 0x125   :  { %v261_v44 = vmul.f32 %v834_v41, %v1140_v23  ;;  %851 = vrsqrt.f32 %v1169_v42  ;;  %v361_v46 = vand.u32 2147483648, %v1158_v63  ;;  %vm390_vm11 = vcmp.eq.f32.partialorder %v1163_v9, inf }
 0x126   :  { %v836_v50 = vpop.eup %835  ;;  %853 = vrsqrt.f32 %v1178_v32  ;;  %vm392_vm12 = vcmp.eq.f32.partialorder %v1163_v9, 0.0  ;;  %v1211_v47 = vadd.f32 1e-08, %v738_v0  ;;  %v393_v19 = vand.u32 2147483648, %v1163_v9 }
 0x127   :  { %v263_v3 = vsel %vm262_vm3, %v1140_v23, %v261_v44  ;;  %v325_v20 = vmul.f32 %v836_v50, %v1152_v49  ;;  %855 = vrsqrt.f32 %v1176_v30  ;;  %vm422_vm13 = vcmp.eq.f32.partialorder %v1166_v55, inf }
 0x128   :  { %v838_v24 = vpop.eup %837  ;;  %v266_v48 = vsel %vm264_vm4, %v265_v39, %v263_v3  ;;  %v1223_v11 = vadd.f32 1e-08, %v706_v45  ;;  %vm424_vm14 = vcmp.eq.f32.partialorder %v1166_v55, 0.0  ;;  %857 = vrsqrt.f32 %v1184_v38 }
 0x129   :  { %v267_v51 = vsel %vm239_vm2, %v266_v48, 0.0  ;;  %v327_v22 = vsel %vm326_vm5, %v1152_v49, %v325_v20  ;;  %v293_v10 = vmul.f32 %v838_v24, %v1077_v12  ;;  %v425_v58 = vand.u32 2147483648, %v1166_v55 }
 0x12a   :  { %v840_v56 = vpop.eup %839  ;;  %268 = vadd.xlane.f32.xlu0 %v267_v51  ;;  %v330_v23 = vsel %vm328_vm6, %v329_v40, %v327_v22  ;;  %vm454_vm15 = vcmp.eq.f32.partialorder %v1180_v34, inf  ;;  %vm456_vm0 = vcmp.eq.f32.partialorder %v1180_v34, 0.0  ;;  %859 = vrsqrt.f32 %v1182_v35 }
 0x12b   :  { %v331_v28 = vsel %vm239_vm2, %v330_v23, 0.0  ;;  %v295_v57 = vsel %vm294_vm7, %v1077_v12, %v293_v10  ;;  %v357_v29 = vmul.f32 %v840_v56, %v1158_v63  ;;  %v842_v59 = vpop.eup %841  ;;  %v457_v1 = vand.u32 2147483648, %v1180_v34 }
 0x12c   :  { %332 = vadd.xlane.f32.xlu1 %v331_v28  ;;  %v298_v49 = vsel %vm296_vm8, %v297_v36, %v295_v57  ;;  %v389_v62 = vmul.f32 %v842_v59, %v1163_v9  ;;  %vm486_vm1 = vcmp.eq.f32.partialorder %v1173_v43, inf  ;;  %vm488_vm3 = vcmp.eq.f32.partialorder %v1173_v43, 0.0 }
 0x12d   :  { %v299_v60 = vsel %vm239_vm2, %v298_v49, 0.0  ;;  %v359_v61 = vsel %vm358_vm9, %v1158_v63, %v357_v29  ;;  %v844_v37 = vpop.eup %843  ;;  %861 = vrsqrt.f32 %v1223_v11  ;;  %v489_v21 = vand.u32 2147483648, %v1173_v43 }
 0x12e   :  { %300 = vadd.xlane.f32.xlu0 %v299_v60  ;;  %v362_v12 = vsel %vm360_vm10, %v361_v46, %v359_v61  ;;  %v391_v5 = vsel %vm390_vm11, %v1163_v9, %v389_v62  ;;  %v421_v6 = vmul.f32 %v844_v37, %v1166_v55  ;;  %vm518_vm4 = vcmp.eq.f32.partialorder %v1171_v27, inf }
 0x12f   :  { %v846_v2 = vpop.eup %845  ;;  %v363_v4 = vsel %vm239_vm2, %v362_v12, 0.0  ;;  %v394_v63 = vsel %vm392_vm12, %v393_v19, %v391_v5  ;;  %863 = vrsqrt.f32 %v1211_v47  ;;  %v521_v16 = vand.u32 2147483648, %v1171_v27 }
 0x130   :  { %v848_v31 = vpop.eup %847  ;;  %364 = vadd.xlane.f32.xlu1 %v363_v4  ;;  %v453_v7 = vmul.f32 %v846_v2, %v1180_v34  ;;  %v395_v8 = vsel %vm239_vm2, %v394_v63, 0.0  ;;  %v423_v52 = vsel %vm422_vm13, %v1166_v55, %v421_v6  ;;  %vm550_vm5 = vcmp.eq.f32.partialorder %v1169_v42, inf }
 0x131   :  { %v850_v54 = vpop.eup %849  ;;  %v485_v53 = vmul.f32 %v848_v31, %v1173_v43  ;;  %v426_v9 = vsel %vm424_vm14, %v425_v58, %v423_v52  ;;  %vm520_vm6 = vcmp.eq.f32.partialorder %v1171_v27, 0.0  ;;  %v553_v36 = vand.u32 2147483648, %v1169_v42 }
 0x132   :  { %v852_v17 = vpop.eup %851  ;;  %396 = vadd.xlane.f32.xlu0 %v395_v8  ;;  %v455_v18 = vsel %vm454_vm15, %v1180_v34, %v453_v7  ;;  %v517_v25 = vmul.f32 %v850_v54, %v1171_v27  ;;  %v427_v13 = vsel %vm239_vm2, %v426_v9, 0.0  ;;  %vm582_vm7 = vcmp.eq.f32.partialorder %v1178_v32, inf }
 0x133   :  { %v854_v26 = vpop.eup %853  ;;  %v458_v15 = vsel %vm456_vm0, %v457_v1, %v455_v18  ;;  %v487_v33 = vsel %vm486_vm1, %v1173_v43, %v485_v53  ;;  %v549_v55 = vmul.f32 %v852_v17, %v1169_v42  ;;  %vm552_vm8 = vcmp.eq.f32.partialorder %v1169_v42, 0.0 }
 0x134   :  { %428 = vadd.xlane.f32.xlu1 %v427_v13  ;;  %v459_v14 = vsel %vm239_vm2, %v458_v15, 0.0  ;;  %v490_v39 = vsel %vm488_vm3, %v489_v21, %v487_v33  ;;  %v519_v40 = vsel %vm518_vm4, %v1171_v27, %v517_v25  ;;  %v581_v41 = vmul.f32 %v854_v26, %v1178_v32  ;;  %v856_v34 = vpop.eup %855 }
 0x135   :  { %v551_v0 = vsel %vm550_vm5, %v1169_v42, %v549_v55  ;;  %v522_v44 = vsel %vm520_vm6, %v521_v16, %v519_v40  ;;  %v613_v43 = vmul.f32 %v856_v34, %v1176_v30  ;;  %v858_v50 = vpop.eup %857  ;;  %v491_v45 = vsel %vm239_vm2, %v490_v39, 0.0 }
 0x136   :  { %460 = vadd.xlane.f32.xlu0 %v459_v14  ;;  %v583_v46 = vsel %vm582_vm7, %v1178_v32, %v581_v41  ;;  %v554_v3 = vsel %vm552_vm8, %v553_v36, %v551_v0  ;;  %v585_v27 = vand.u32 2147483648, %v1178_v32  ;;  %vm614_vm9 = vcmp.eq.f32.partialorder %v1176_v30, inf }
 0x137   :  { %v645_v20 = vmul.f32 %v858_v50, %v1184_v38  ;;  %v860_v24 = vpop.eup %859  ;;  %v523_v48 = vsel %vm239_vm2, %v522_v44, 0.0  ;;  %vm584_vm10 = vcmp.eq.f32.partialorder %v1178_v32, 0.0  ;;  %v615_v19 = vsel %vm614_vm9, %v1176_v30, %v613_v43 }
 0x138   :  { %492 = vadd.xlane.f32.xlu1 %v491_v45  ;;  %v586_v51 = vsel %vm584_vm10, %v585_v27, %v583_v46  ;;  %v617_v42 = vand.u32 2147483648, %v1176_v30  ;;  %vm646_vm11 = vcmp.eq.f32.partialorder %v1184_v38, inf  ;;  %v677_v22 = vmul.f32 %v860_v24, %v1182_v35 }
 0x139   :  { %v555_v56 = vsel %vm239_vm2, %v554_v3, 0.0  ;;  %vm616_vm12 = vcmp.eq.f32.partialorder %v1176_v30, 0.0  ;;  %v647_v23 = vsel %vm646_vm11, %v1184_v38, %v645_v20  ;;  %v649_v32 = vand.u32 2147483648, %v1184_v38 }
 0x13a   :  { %524 = vadd.xlane.f32.xlu0 %v523_v48  ;;  %v862_v10 = vpop.eup %861  ;;  %v618_v28 = vsel %vm616_vm12, %v617_v42, %v615_v19  ;;  %vm678_vm13 = vcmp.eq.f32.partialorder %v1182_v35, inf  ;;  %v587_v58 = vsel %vm239_vm2, %v586_v51, 0.0  ;;  %vm648_vm14 = vcmp.eq.f32.partialorder %v1184_v38, 0.0 }
 0x13b   :  { %v709_v57 = vmul.f32 %v862_v10, %v1223_v11  ;;  %v679_v59 = vsel %vm678_vm13, %v1182_v35, %v677_v22  ;;  %v650_v49 = vsel %vm648_vm14, %v649_v32, %v647_v23  ;;  %v681_v30 = vand.u32 2147483648, %v1182_v35 }
 0x13c   :  { %556 = vadd.xlane.f32.xlu1 %v555_v56  ;;  %v864_v29 = vpop.eup %863  ;;  %vm710_vm15 = vcmp.eq.f32.partialorder %v1223_v11, inf  ;;  %v619_v61 = vsel %vm239_vm2, %v618_v28, 0.0  ;;  %vm680_vm0 = vcmp.eq.f32.partialorder %v1182_v35, 0.0  ;;  %v713_v38 = vand.u32 2147483648, %v1223_v11 }
 0x13d   :  { %v741_v60 = vmul.f32 %v864_v29, %v1211_v47  ;;  %v711_v62 = vsel %vm710_vm15, %v1223_v11, %v709_v57  ;;  %v682_v1 = vsel %vm680_vm0, %v681_v30, %v679_v59  ;;  %vm742_vm1 = vcmp.eq.f32.partialorder %v1211_v47, inf }
 0x13e   :  { %588 = vadd.xlane.f32.xlu0 %v587_v58  ;;  %v651_v37 = vsel %vm239_vm2, %v650_v49, 0.0  ;;  %vm712_vm3 = vcmp.eq.f32.partialorder %v1223_v11, 0.0  ;;  %v745_v4 = vand.u32 2147483648, %v1211_v47  ;;  %v683_v35 = vsel %vm239_vm2, %v682_v1, 0.0 }
 0x13f   :  { %v743_v12 = vsel %vm742_vm1, %v1211_v47, %v741_v60  ;;  %v714_v2 = vsel %vm712_vm3, %v713_v38, %v711_v62  ;;  %vm744_vm4 = vcmp.eq.f32.partialorder %v1211_v47, 0.0 }
 0x140   :  { %620 = vadd.xlane.f32.xlu1 %v619_v61  ;;  %v746_v5 = vsel %vm744_vm4, %v745_v4, %v743_v12  ;;  %v715_v6 = vsel %vm239_vm2, %v714_v2, 0.0 }
 0x141   :  { %v747_v21 = vsel %vm239_vm2, %v746_v5, 0.0  ;;  %vm752_vm2 = vcmask 0  }
 0x142   :  { %652 = vadd.xlane.f32.xlu0 %v651_v37 }
 0x144   :  { %684 = vadd.xlane.f32.xlu1 %v683_v35 }
 0x146   :  { %716 = vadd.xlane.f32.xlu0 %v715_v6 }
 0x148   :  { %748 = vadd.xlane.f32.xlu1 %v747_v21 }
 0x1b3   :  { %v269_v31 = vpop.xlane.xlu0 %268 }
 0x1b5   :  { %v333_v11 = vpop.xlane.xlu1 %332 }
 0x1b7   :  { %v301_v63 = vpop.xlane.xlu0 %300 }
 0x1b8   :  { %v302_v7 = vadd.f32 %v301_v63, %v269_v31 }
 0x1b9   :  { %v365_v54 = vpop.xlane.xlu1 %364 }
 0x1ba   :  { %v334_v8 = vadd.f32 %v333_v11, %v302_v7 }
 0x1bb   :  { %v397_v52 = vpop.xlane.xlu0 %396 }
 0x1bc   :  { %v366_v53 = vadd.f32 %v365_v54, %v334_v8 }
 0x1bd   :  { %v429_v16 = vpop.xlane.xlu1 %428 }
 0x1be   :  { %v398_v17 = vadd.f32 %v397_v52, %v366_v53 }
 0x1bf   :  { %v461_v9 = vpop.xlane.xlu0 %460 }
 0x1c0   :  { %v430_v47 = vadd.f32 %v429_v16, %v398_v17 }
 0x1c1   :  { %v493_v18 = vpop.xlane.xlu1 %492 }
 0x1c2   :  { %v462_v25 = vadd.f32 %v461_v9, %v430_v47 }
 0x1c3   :  { %v525_v26 = vpop.xlane.xlu0 %524 }
 0x1c4   :  { %v494_v13 = vadd.f32 %v493_v18, %v462_v25 }
 0x1c5   :  { %v557_v15 = vpop.xlane.xlu1 %556 }
 0x1c6   :  { %v526_v33 = vadd.f32 %v525_v26, %v494_v13 }
 0x1c7   :  { %v589_v55 = vpop.xlane.xlu0 %588 }
 0x1c8   :  { %v558_v14 = vadd.f32 %v557_v15, %v526_v33 }
 0x1c9   :  { %v621_v39 = vpop.xlane.xlu1 %620 }
 0x1ca   :  { %v590_v40 = vadd.f32 %v589_v55, %v558_v14 }
 0x1cb   :  { %v653_v41 = vpop.xlane.xlu0 %652 }
 0x1cc   :  { %v622_v34 = vadd.f32 %v621_v39, %v590_v40 }
 0x1cd   :  { %v685_v0 = vpop.xlane.xlu1 %684 }
 0x1ce   :  { %v654_v44 = vadd.f32 %v653_v41, %v622_v34 }
 0x1cf   :  { %v717_v43 = vpop.xlane.xlu0 %716 }
 0x1d0   :  { %v686_v36 = vadd.f32 %v685_v0, %v654_v44 }
 0x1d1   :  { %v749_v50 = vpop.xlane.xlu1 %748 }
 0x1d2   :  { %v718_v45 = vadd.f32 %v717_v43, %v686_v36 }
 0x1d4   :  { %v750_v46 = vadd.f32 %v749_v50, %v718_v45 }
 0x1d6   :  { %v751_v3 = vmul.f32 0.001953125, %v750_v46 }
 0x1d8   :  { %753 = vst.msk [vmem:[#allocation2] sm:$0x1] %vm752_vm2, %v751_v3 }
 0x1d9   :  { %876 = shalt.err (!%p873_p4)
}
 0x1da   :  { %763 = dma.vmem_to_hbm [thread:$0]  %s761_s2, 16, %s1337_s3, [#allocation3]  }
 0x1db   :  { %885 = dma.done.wait [#allocation3], 16  }
 0x1dc   :  { %886 = vsyncadd [#allocation3], 4294967280 }
 0x1dd   :  { %767 = vsyncpa [#allocation3], 1 }

</bundles_post_ra>
